<compile_context>
chip_gen: v7x
topology: tpu7x:2x2x1
jax: 0.10.0
libtpu: 0.0.40
codegen_flags: <defaults>
</compile_context>

<pallas_src>
import functools

import numpy as np
import jax
import jax.numpy as jnp
from jax.experimental import pallas as pl
from jax.experimental.pallas import tpu as pltpu


def _skip_upsample_kernel(x_ref, w_ref, u_ref, y_ref, o_ref):
    # x_ref: (Cin, H, W)       full input image, resident per batch
    # w_ref: (Cout, Cin)       1x1-conv weight scalars in SMEM
    # u_ref: (W, 2W) bf16      column 2x-upsample matrix (blend + edge clamp + interleave)
    # y_ref: (Cout, TH, 4W)    skip, in the (H, 4W) row-pair view
    # o_ref: (Cout, TH, 4W)    output, same view
    cin, h, wi = x_ref.shape
    cout, th, w4 = o_ref.shape
    w2 = w4 // 2

    t = pl.program_id(1)
    k0 = pl.multiple_of(t * th, th)            # first input row of this tile (sublane aligned)
    kp = jnp.maximum(k0 - 1, 0)                # row above (edge clamped)
    kn = jnp.minimum(k0 + th, h - 1)           # row below (edge clamped)

    def conv(xin):                             # (Cin, R, W) -> (Cout, R, W); VPU FMAs, f32
        outs = []
        for co in range(cout):
            acc = xin[0] * w_ref[co, 0]
            for ci in range(1, cin):
                acc = acc + xin[ci] * w_ref[co, ci]
            outs.append(acc)
        return jnp.stack(outs, axis=0)

    # 1x1 conv (channel mix) commuted BEFORE the upsample: tile rows + the two 1-row halos.
    ct = conv(x_ref[:, pl.ds(k0, th), :].astype(jnp.float32))        # (Cout, TH, W)
    cp = conv(x_ref[:, pl.ds(kp, 1), :].astype(jnp.float32))         # (Cout, 1, W)
    cn = conv(x_ref[:, pl.ds(kn, 1), :].astype(jnp.float32))         # (Cout, 1, W)

    # Column 2x upsample (0.75/0.25 blend + clamp + even/odd interleave) as ONE bf16 MXU
    # matmul over tile + halo rows.
    lhs = jnp.concatenate(
        [ct.reshape(cout * th, wi), cp.reshape(cout, wi), cn.reshape(cout, wi)],
        axis=0).astype(jnp.bfloat16)                                  # (Cout*TH + 2*Cout, W)
    cu_all = jnp.dot(lhs, u_ref[...], preferred_element_type=jnp.float32)

    m = cout * th
    cu2 = cu_all[:m]                                                  # (Cout*TH, 2W)
    cup = cu_all[m:m + cout].reshape(cout, 1, w2)                     # row above tile
    cun = cu_all[m + cout:].reshape(cout, 1, w2)                      # row below tile

    # Row 2x upsample: +-1 row neighbours via sublane rotate on the XLU.  The wrapped rows
    # (first / last row of each channel's tile) are patched from the halo rows below, so the
    # cross-channel wraparound of the 2-D roll is harmless.
    prev = pltpu.roll(cu2, shift=1, axis=0).reshape(cout, th, w2)     # prev[k] = cu[k-1]
    nxt = pltpu.roll(cu2, shift=m - 1, axis=0).reshape(cout, th, w2)  # nxt[k]  = cu[k+1]
    cu = cu2.reshape(cout, th, w2)

    ridx = jax.lax.broadcasted_iota(jnp.int32, (cout, th, w2), 1)
    prev = jnp.where(ridx == 0, cup, prev)
    nxt = jnp.where(ridx == th - 1, cun, nxt)

    r_even = 0.75 * cu + 0.25 * prev                  # output rows 2*(k0+k)
    r_odd = 0.75 * cu + 0.25 * nxt                    # output rows 2*(k0+k)+1

    # Skip add; write the even/odd lane halves directly (no concatenated temp).
    yv = y_ref[...].astype(jnp.float32)
    o_ref[:, :, :w2] = (r_even + yv[:, :, :w2]).astype(o_ref.dtype)
    o_ref[:, :, w2:] = (r_odd + yv[:, :, w2:]).astype(o_ref.dtype)


def _col_upsample_matrix(w: int) -> np.ndarray:
    """(W, 2W): out[s] = 0.75*in[s//2] + 0.25*in[clamp(s//2 -/+ 1)] (even/odd), interleaved."""
    s = np.arange(2 * w)
    j_main = s // 2
    j_side = np.where(s % 2 == 0, np.maximum(j_main - 1, 0), np.minimum(j_main + 1, w - 1))
    u = np.zeros((w, 2 * w), np.float32)
    np.add.at(u, (j_main, s), 0.75)
    np.add.at(u, (j_side, s), 0.25)        # edge columns collapse to a single 1.0
    return u


def _vmem_budget_bytes() -> int:
    try:
        cap = int(pltpu.get_tpu_info().vmem_capacity_bytes)   # 128 MiB v5e/v6e, 64 MiB v7x
    except Exception:
        cap = 64 * 1024 * 1024                                # conservative fallback
    return (cap * 3) // 4                                     # headroom for Mosaic scratch


def _estimate_vmem(th, h, wi, cin, cout, itemsize):
    x_res = 2 * cin * h * wi * itemsize                 # per-batch resident x (double-buffered)
    yo = 2 * 2 * cout * th * 4 * wi * itemsize          # y + out tiles (double-buffered)
    umat = 2 * wi * 2 * wi * 2                          # bf16 U (double-buffered)
    tmp = 4 * th * wi * (cin + 12 * cout)               # f32 in-kernel intermediates (generous)
    return x_res + yo + umat + tmp


def _pick_tile_h(h, wi, cin, cout, itemsize, budget):
    # Prefer TH == H; only tile the H axis when VMEM-bound (and only in multiples of 8).
    if h % 8 != 0 or _estimate_vmem(h, h, wi, cin, cout, itemsize) <= budget:
        return h
    for th in range(h - 8, 7, -8):
        if h % th == 0 and _estimate_vmem(th, h, wi, cin, cout, itemsize) <= budget:
            return th
    return 8


@functools.partial(jax.jit, static_argnames=("tile_h",))
def skip_upsample(x, y, w, *, tile_h=None):
    """x: (N, Cin, H, W), y: (N, Cout, 2H, 2W), w: (Cout, Cin) -> (N, Cout, 2H, 2W)."""
    b, cin, h, wi = x.shape
    by, cout, h2, w2 = y.shape
    assert by == b and h2 == 2 * h and w2 == 2 * wi and w.shape == (cout, cin)

    budget = _vmem_budget_bytes()
    itemsize = jnp.dtype(x.dtype).itemsize
    th = _pick_tile_h(h, wi, cin, cout, itemsize, budget) if tile_h is None else tile_h
    assert h % th == 0 and (th == h or th % 8 == 0), (
        "tile_h must divide H and be a multiple of 8 (or equal H)")
    num_t = h // th

    u = jnp.asarray(_col_upsample_matrix(wi), dtype=jnp.bfloat16)    # MXU-native operand
    y_view = y.reshape(b, cout, h, 4 * wi)     # free view: output rows 2k, 2k+1 side by side

    out_view = pl.pallas_call(
        _skip_upsample_kernel,
        out_shape=jax.ShapeDtypeStruct((b, cout, h, 4 * wi), x.dtype),
        grid=(b, num_t),
        in_specs=[
            pl.BlockSpec((None, cin, h, wi), lambda n, t: (n, 0, 0, 0)),   # x resident / batch
            pl.BlockSpec(memory_space=pltpu.MemorySpace.SMEM),             # conv weight scalars
            pl.BlockSpec((wi, 2 * wi), lambda n, t: (0, 0)),               # U (constant block)
            pl.BlockSpec((None, cout, th, 4 * wi), lambda n, t: (n, 0, t, 0)),
        ],
        out_specs=pl.BlockSpec((None, cout, th, 4 * wi), lambda n, t: (n, 0, t, 0)),
        compiler_params=pltpu.CompilerParams(
            dimension_semantics=("parallel", "parallel"),
            vmem_limit_bytes=int(budget)),
    )(x, w, u, y_view)

    return out_view.reshape(b, cout, 2 * h, 2 * wi)


# ---------------- pure-JAX reference (matches PyTorch semantics, NCHW) ----------------
def _upsample_bilinear_2x_nchw(x):  # scale=2, align_corners=False
    def up_axis(arr, axis):
        n_in = arr.shape[axis]
        n_out = 2 * n_in
        src = (jnp.arange(n_out, dtype=jnp.float32) + 0.5) / 2.0 - 0.5
        src = jnp.maximum(src, 0.0)
        lo = jnp.floor(src).astype(jnp.int32)
        hi = jnp.minimum(lo + 1, n_in - 1)
        frac = src - lo.astype(jnp.float32)
        a = jnp.take(arr, lo, axis=axis)
        bb = jnp.take(arr, hi, axis=axis)
        shp = [1] * arr.ndim
        shp[axis] = n_out
        return a * (1.0 - frac.reshape(shp)) + bb * frac.reshape(shp)

    x = up_axis(x, 2)   # H
    x = up_axis(x, 3)   # W
    return x


def skip_upsample_ref(x, y, w):
    return jnp.einsum("nchw,oc->nohw", _upsample_bilinear_2x_nchw(x), w) + y


if __name__ == "__main__":
    # module config: SkipUpSample(in_channels=4, s_factor=4)
    in_channels, s_factor = 4, 4
    cin = in_channels + s_factor      # 8
    cout = in_channels                # 4

    key = jax.random.PRNGKey(0)
    kx, ky, kw, kx2, ky2 = jax.random.split(key, 5)
    w = 0.1 * jax.random.normal(kw, (cout, cin), dtype=jnp.float32)

    # Test 1: default path (TH == H -> single grid step per batch, clamp-only halo).
    n, h, wi = 2, 16, 16
    x = jax.random.normal(kx, (n, cin, h, wi), dtype=jnp.float32)
    y = jax.random.normal(ky, (n, cout, 2 * h, 2 * wi), dtype=jnp.float32)
    out = skip_upsample(x, y, w)
    jax.block_until_ready(out)
    ref = skip_upsample_ref(x, y, w)
    assert out.shape == (n, cout, 2 * h, 2 * wi)
    # Tolerance accounts for the single bf16 rounding of the conv output fed to the MXU.
    assert jnp.allclose(out, ref, atol=1e-2, rtol=1e-2), float(jnp.max(jnp.abs(out - ref)))

    # Test 2: forced H tiling on a non-square image (exercises roll + halo-row patch path).
    n2, hh, wi2 = 1, 24, 16
    x2 = jax.random.normal(kx2, (n2, cin, hh, wi2), dtype=jnp.float32)
    y2 = jax.random.normal(ky2, (n2, cout, 2 * hh, 2 * wi2), dtype=jnp.float32)
    out2 = skip_upsample(x2, y2, w, tile_h=8)
    jax.block_until_ready(out2)
    ref2 = skip_upsample_ref(x2, y2, w)
    assert jnp.allclose(out2, ref2, atol=1e-2, rtol=1e-2), float(jnp.max(jnp.abs(out2 - ref2)))

    print("KERNEL_OK")
</pallas_src>

<mosaic_0001>
module attributes {stable_mosaic.version = 11 : i64} {
  func.func @_skip_upsample_kernel(%arg0: i32, %arg1: i32, %arg2: memref<1x8x16x16xf32, #tpu.memory_space<vmem>>, %arg3: memref<4x8xf32, #tpu.memory_space<smem>>, %arg4: memref<16x32xbf16, #tpu.memory_space<vmem>>, %arg5: memref<1x4x16x64xf32, #tpu.memory_space<vmem>>, %arg6: memref<1x4x16x64xf32, #tpu.memory_space<vmem>>) attributes {dimension_semantics = [#tpu.dimension_semantics<parallel>, #tpu.dimension_semantics<parallel>], iteration_bounds = array<i64: 2, 1>, scalar_prefetch = 0 : i64, scratch_operands = 0 : i64, tpu.core_type = #tpu.core_type<tc>, window_params = [{transform_indices = @transform_0, window_bounds = array<i64: 1, 8, 16, 16>}, {transform_indices = @transform_1, window_bounds = array<i64: 4, 8>}, {pipeline_mode = #tpu.pipeline_mode<synchronous>, transform_indices = @transform_2, window_bounds = array<i64: 16, 32>}, {transform_indices = @transform_3, window_bounds = array<i64: 1, 4, 16, 64>}, {transform_indices = @transform_4, window_bounds = array<i64: 1, 4, 16, 64>}]} {
    %c16_i32 = arith.constant 16 : i32
    %0 = arith.muli %arg1, %c16_i32 : i32
    %1 = tpu.assume_multiple %0, 16 : i32
    %c1_i32 = arith.constant 1 : i32
    %2 = arith.subi %1, %c1_i32 : i32
    %c0_i32 = arith.constant 0 : i32
    %3 = arith.maxsi %2, %c0_i32 : i32
    %c16_i32_0 = arith.constant 16 : i32
    %4 = arith.addi %1, %c16_i32_0 : i32
    %c15_i32 = arith.constant 15 : i32
    %5 = arith.minsi %4, %c15_i32 : i32
    %c0 = arith.constant 0 : index
    %c0_1 = arith.constant 0 : index
    %6 = arith.index_cast %1 : i32 to index
    %c0_2 = arith.constant 0 : index
    %7 = vector.load %arg2[%c0, %c0_1, %6, %c0_2] : memref<1x8x16x16xf32, #tpu.memory_space<vmem>>, vector<1x8x16x16xf32>
    %8 = vector.shape_cast %7 : vector<1x8x16x16xf32> to vector<8x16x16xf32>
    %9 = vector.extract_strided_slice %8 {offsets = [0, 0, 0], sizes = [1, 16, 16], strides = [1, 1, 1]} : vector<8x16x16xf32> to vector<1x16x16xf32>
    %10 = vector.shape_cast %9 : vector<1x16x16xf32> to vector<16x16xf32>
    %c0_3 = arith.constant 0 : index
    %c0_4 = arith.constant 0 : index
    %11 = memref.load %arg3[%c0_3, %c0_4] : memref<4x8xf32, #tpu.memory_space<smem>>
    %12 = vector.broadcast %11 : f32 to vector<16x16xf32>
    %13 = arith.mulf %10, %12 : vector<16x16xf32>
    %14 = vector.extract_strided_slice %8 {offsets = [1, 0, 0], sizes = [1, 16, 16], strides = [1, 1, 1]} : vector<8x16x16xf32> to vector<1x16x16xf32>
    %15 = vector.shape_cast %14 : vector<1x16x16xf32> to vector<16x16xf32>
    %c0_5 = arith.constant 0 : index
    %c1 = arith.constant 1 : index
    %16 = memref.load %arg3[%c0_5, %c1] : memref<4x8xf32, #tpu.memory_space<smem>>
    %17 = vector.broadcast %16 : f32 to vector<16x16xf32>
    %18 = arith.mulf %15, %17 : vector<16x16xf32>
    %19 = arith.addf %13, %18 : vector<16x16xf32>
    %20 = vector.extract_strided_slice %8 {offsets = [2, 0, 0], sizes = [1, 16, 16], strides = [1, 1, 1]} : vector<8x16x16xf32> to vector<1x16x16xf32>
    %21 = vector.shape_cast %20 : vector<1x16x16xf32> to vector<16x16xf32>
    %c0_6 = arith.constant 0 : index
    %c2 = arith.constant 2 : index
    %22 = memref.load %arg3[%c0_6, %c2] : memref<4x8xf32, #tpu.memory_space<smem>>
    %23 = vector.broadcast %22 : f32 to vector<16x16xf32>
    %24 = arith.mulf %21, %23 : vector<16x16xf32>
    %25 = arith.addf %19, %24 : vector<16x16xf32>
    %26 = vector.extract_strided_slice %8 {offsets = [3, 0, 0], sizes = [1, 16, 16], strides = [1, 1, 1]} : vector<8x16x16xf32> to vector<1x16x16xf32>
    %27 = vector.shape_cast %26 : vector<1x16x16xf32> to vector<16x16xf32>
    %c0_7 = arith.constant 0 : index
    %c3 = arith.constant 3 : index
    %28 = memref.load %arg3[%c0_7, %c3] : memref<4x8xf32, #tpu.memory_space<smem>>
    %29 = vector.broadcast %28 : f32 to vector<16x16xf32>
    %30 = arith.mulf %27, %29 : vector<16x16xf32>
    %31 = arith.addf %25, %30 : vector<16x16xf32>
    %32 = vector.extract_strided_slice %8 {offsets = [4, 0, 0], sizes = [1, 16, 16], strides = [1, 1, 1]} : vector<8x16x16xf32> to vector<1x16x16xf32>
    %33 = vector.shape_cast %32 : vector<1x16x16xf32> to vector<16x16xf32>
    %c0_8 = arith.constant 0 : index
    %c4 = arith.constant 4 : index
    %34 = memref.load %arg3[%c0_8, %c4] : memref<4x8xf32, #tpu.memory_space<smem>>
    %35 = vector.broadcast %34 : f32 to vector<16x16xf32>
    %36 = arith.mulf %33, %35 : vector<16x16xf32>
    %37 = arith.addf %31, %36 : vector<16x16xf32>
    %38 = vector.extract_strided_slice %8 {offsets = [5, 0, 0], sizes = [1, 16, 16], strides = [1, 1, 1]} : vector<8x16x16xf32> to vector<1x16x16xf32>
    %39 = vector.shape_cast %38 : vector<1x16x16xf32> to vector<16x16xf32>
    %c0_9 = arith.constant 0 : index
    %c5 = arith.constant 5 : index
    %40 = memref.load %arg3[%c0_9, %c5] : memref<4x8xf32, #tpu.memory_space<smem>>
    %41 = vector.broadcast %40 : f32 to vector<16x16xf32>
    %42 = arith.mulf %39, %41 : vector<16x16xf32>
    %43 = arith.addf %37, %42 : vector<16x16xf32>
    %44 = vector.extract_strided_slice %8 {offsets = [6, 0, 0], sizes = [1, 16, 16], strides = [1, 1, 1]} : vector<8x16x16xf32> to vector<1x16x16xf32>
    %45 = vector.shape_cast %44 : vector<1x16x16xf32> to vector<16x16xf32>
    %c0_10 = arith.constant 0 : index
    %c6 = arith.constant 6 : index
    %46 = memref.load %arg3[%c0_10, %c6] : memref<4x8xf32, #tpu.memory_space<smem>>
    %47 = vector.broadcast %46 : f32 to vector<16x16xf32>
    %48 = arith.mulf %45, %47 : vector<16x16xf32>
    %49 = arith.addf %43, %48 : vector<16x16xf32>
    %50 = vector.extract_strided_slice %8 {offsets = [7, 0, 0], sizes = [1, 16, 16], strides = [1, 1, 1]} : vector<8x16x16xf32> to vector<1x16x16xf32>
    %51 = vector.shape_cast %50 : vector<1x16x16xf32> to vector<16x16xf32>
    %c0_11 = arith.constant 0 : index
    %c7 = arith.constant 7 : index
    %52 = memref.load %arg3[%c0_11, %c7] : memref<4x8xf32, #tpu.memory_space<smem>>
    %53 = vector.broadcast %52 : f32 to vector<16x16xf32>
    %54 = arith.mulf %51, %53 : vector<16x16xf32>
    %55 = arith.addf %49, %54 : vector<16x16xf32>
    %56 = vector.extract_strided_slice %8 {offsets = [0, 0, 0], sizes = [1, 16, 16], strides = [1, 1, 1]} : vector<8x16x16xf32> to vector<1x16x16xf32>
    %57 = vector.shape_cast %56 : vector<1x16x16xf32> to vector<16x16xf32>
    %c1_12 = arith.constant 1 : index
    %c0_13 = arith.constant 0 : index
    %58 = memref.load %arg3[%c1_12, %c0_13] : memref<4x8xf32, #tpu.memory_space<smem>>
    %59 = vector.broadcast %58 : f32 to vector<16x16xf32>
    %60 = arith.mulf %57, %59 : vector<16x16xf32>
    %61 = vector.extract_strided_slice %8 {offsets = [1, 0, 0], sizes = [1, 16, 16], strides = [1, 1, 1]} : vector<8x16x16xf32> to vector<1x16x16xf32>
    %62 = vector.shape_cast %61 : vector<1x16x16xf32> to vector<16x16xf32>
    %c1_14 = arith.constant 1 : index
    %c1_15 = arith.constant 1 : index
    %63 = memref.load %arg3[%c1_14, %c1_15] : memref<4x8xf32, #tpu.memory_space<smem>>
    %64 = vector.broadcast %63 : f32 to vector<16x16xf32>
    %65 = arith.mulf %62, %64 : vector<16x16xf32>
    %66 = arith.addf %60, %65 : vector<16x16xf32>
    %67 = vector.extract_strided_slice %8 {offsets = [2, 0, 0], sizes = [1, 16, 16], strides = [1, 1, 1]} : vector<8x16x16xf32> to vector<1x16x16xf32>
    %68 = vector.shape_cast %67 : vector<1x16x16xf32> to vector<16x16xf32>
    %c1_16 = arith.constant 1 : index
    %c2_17 = arith.constant 2 : index
    %69 = memref.load %arg3[%c1_16, %c2_17] : memref<4x8xf32, #tpu.memory_space<smem>>
    %70 = vector.broadcast %69 : f32 to vector<16x16xf32>
    %71 = arith.mulf %68, %70 : vector<16x16xf32>
    %72 = arith.addf %66, %71 : vector<16x16xf32>
    %73 = vector.extract_strided_slice %8 {offsets = [3, 0, 0], sizes = [1, 16, 16], strides = [1, 1, 1]} : vector<8x16x16xf32> to vector<1x16x16xf32>
    %74 = vector.shape_cast %73 : vector<1x16x16xf32> to vector<16x16xf32>
    %c1_18 = arith.constant 1 : index
    %c3_19 = arith.constant 3 : index
    %75 = memref.load %arg3[%c1_18, %c3_19] : memref<4x8xf32, #tpu.memory_space<smem>>
    %76 = vector.broadcast %75 : f32 to vector<16x16xf32>
    %77 = arith.mulf %74, %76 : vector<16x16xf32>
    %78 = arith.addf %72, %77 : vector<16x16xf32>
    %79 = vector.extract_strided_slice %8 {offsets = [4, 0, 0], sizes = [1, 16, 16], strides = [1, 1, 1]} : vector<8x16x16xf32> to vector<1x16x16xf32>
    %80 = vector.shape_cast %79 : vector<1x16x16xf32> to vector<16x16xf32>
    %c1_20 = arith.constant 1 : index
    %c4_21 = arith.constant 4 : index
    %81 = memref.load %arg3[%c1_20, %c4_21] : memref<4x8xf32, #tpu.memory_space<smem>>
    %82 = vector.broadcast %81 : f32 to vector<16x16xf32>
    %83 = arith.mulf %80, %82 : vector<16x16xf32>
    %84 = arith.addf %78, %83 : vector<16x16xf32>
    %85 = vector.extract_strided_slice %8 {offsets = [5, 0, 0], sizes = [1, 16, 16], strides = [1, 1, 1]} : vector<8x16x16xf32> to vector<1x16x16xf32>
    %86 = vector.shape_cast %85 : vector<1x16x16xf32> to vector<16x16xf32>
    %c1_22 = arith.constant 1 : index
    %c5_23 = arith.constant 5 : index
    %87 = memref.load %arg3[%c1_22, %c5_23] : memref<4x8xf32, #tpu.memory_space<smem>>
    %88 = vector.broadcast %87 : f32 to vector<16x16xf32>
    %89 = arith.mulf %86, %88 : vector<16x16xf32>
    %90 = arith.addf %84, %89 : vector<16x16xf32>
    %91 = vector.extract_strided_slice %8 {offsets = [6, 0, 0], sizes = [1, 16, 16], strides = [1, 1, 1]} : vector<8x16x16xf32> to vector<1x16x16xf32>
    %92 = vector.shape_cast %91 : vector<1x16x16xf32> to vector<16x16xf32>
    %c1_24 = arith.constant 1 : index
    %c6_25 = arith.constant 6 : index
    %93 = memref.load %arg3[%c1_24, %c6_25] : memref<4x8xf32, #tpu.memory_space<smem>>
    %94 = vector.broadcast %93 : f32 to vector<16x16xf32>
    %95 = arith.mulf %92, %94 : vector<16x16xf32>
    %96 = arith.addf %90, %95 : vector<16x16xf32>
    %97 = vector.extract_strided_slice %8 {offsets = [7, 0, 0], sizes = [1, 16, 16], strides = [1, 1, 1]} : vector<8x16x16xf32> to vector<1x16x16xf32>
    %98 = vector.shape_cast %97 : vector<1x16x16xf32> to vector<16x16xf32>
    %c1_26 = arith.constant 1 : index
    %c7_27 = arith.constant 7 : index
    %99 = memref.load %arg3[%c1_26, %c7_27] : memref<4x8xf32, #tpu.memory_space<smem>>
    %100 = vector.broadcast %99 : f32 to vector<16x16xf32>
    %101 = arith.mulf %98, %100 : vector<16x16xf32>
    %102 = arith.addf %96, %101 : vector<16x16xf32>
    %103 = vector.extract_strided_slice %8 {offsets = [0, 0, 0], sizes = [1, 16, 16], strides = [1, 1, 1]} : vector<8x16x16xf32> to vector<1x16x16xf32>
    %104 = vector.shape_cast %103 : vector<1x16x16xf32> to vector<16x16xf32>
    %c2_28 = arith.constant 2 : index
    %c0_29 = arith.constant 0 : index
    %105 = memref.load %arg3[%c2_28, %c0_29] : memref<4x8xf32, #tpu.memory_space<smem>>
    %106 = vector.broadcast %105 : f32 to vector<16x16xf32>
    %107 = arith.mulf %104, %106 : vector<16x16xf32>
    %108 = vector.extract_strided_slice %8 {offsets = [1, 0, 0], sizes = [1, 16, 16], strides = [1, 1, 1]} : vector<8x16x16xf32> to vector<1x16x16xf32>
    %109 = vector.shape_cast %108 : vector<1x16x16xf32> to vector<16x16xf32>
    %c2_30 = arith.constant 2 : index
    %c1_31 = arith.constant 1 : index
    %110 = memref.load %arg3[%c2_30, %c1_31] : memref<4x8xf32, #tpu.memory_space<smem>>
    %111 = vector.broadcast %110 : f32 to vector<16x16xf32>
    %112 = arith.mulf %109, %111 : vector<16x16xf32>
    %113 = arith.addf %107, %112 : vector<16x16xf32>
    %114 = vector.extract_strided_slice %8 {offsets = [2, 0, 0], sizes = [1, 16, 16], strides = [1, 1, 1]} : vector<8x16x16xf32> to vector<1x16x16xf32>
    %115 = vector.shape_cast %114 : vector<1x16x16xf32> to vector<16x16xf32>
    %c2_32 = arith.constant 2 : index
    %c2_33 = arith.constant 2 : index
    %116 = memref.load %arg3[%c2_32, %c2_33] : memref<4x8xf32, #tpu.memory_space<smem>>
    %117 = vector.broadcast %116 : f32 to vector<16x16xf32>
    %118 = arith.mulf %115, %117 : vector<16x16xf32>
    %119 = arith.addf %113, %118 : vector<16x16xf32>
    %120 = vector.extract_strided_slice %8 {offsets = [3, 0, 0], sizes = [1, 16, 16], strides = [1, 1, 1]} : vector<8x16x16xf32> to vector<1x16x16xf32>
    %121 = vector.shape_cast %120 : vector<1x16x16xf32> to vector<16x16xf32>
    %c2_34 = arith.constant 2 : index
    %c3_35 = arith.constant 3 : index
    %122 = memref.load %arg3[%c2_34, %c3_35] : memref<4x8xf32, #tpu.memory_space<smem>>
    %123 = vector.broadcast %122 : f32 to vector<16x16xf32>
    %124 = arith.mulf %121, %123 : vector<16x16xf32>
    %125 = arith.addf %119, %124 : vector<16x16xf32>
    %126 = vector.extract_strided_slice %8 {offsets = [4, 0, 0], sizes = [1, 16, 16], strides = [1, 1, 1]} : vector<8x16x16xf32> to vector<1x16x16xf32>
    %127 = vector.shape_cast %126 : vector<1x16x16xf32> to vector<16x16xf32>
    %c2_36 = arith.constant 2 : index
    %c4_37 = arith.constant 4 : index
    %128 = memref.load %arg3[%c2_36, %c4_37] : memref<4x8xf32, #tpu.memory_space<smem>>
    %129 = vector.broadcast %128 : f32 to vector<16x16xf32>
    %130 = arith.mulf %127, %129 : vector<16x16xf32>
    %131 = arith.addf %125, %130 : vector<16x16xf32>
    %132 = vector.extract_strided_slice %8 {offsets = [5, 0, 0], sizes = [1, 16, 16], strides = [1, 1, 1]} : vector<8x16x16xf32> to vector<1x16x16xf32>
    %133 = vector.shape_cast %132 : vector<1x16x16xf32> to vector<16x16xf32>
    %c2_38 = arith.constant 2 : index
    %c5_39 = arith.constant 5 : index
    %134 = memref.load %arg3[%c2_38, %c5_39] : memref<4x8xf32, #tpu.memory_space<smem>>
    %135 = vector.broadcast %134 : f32 to vector<16x16xf32>
    %136 = arith.mulf %133, %135 : vector<16x16xf32>
    %137 = arith.addf %131, %136 : vector<16x16xf32>
    %138 = vector.extract_strided_slice %8 {offsets = [6, 0, 0], sizes = [1, 16, 16], strides = [1, 1, 1]} : vector<8x16x16xf32> to vector<1x16x16xf32>
    %139 = vector.shape_cast %138 : vector<1x16x16xf32> to vector<16x16xf32>
    %c2_40 = arith.constant 2 : index
    %c6_41 = arith.constant 6 : index
    %140 = memref.load %arg3[%c2_40, %c6_41] : memref<4x8xf32, #tpu.memory_space<smem>>
    %141 = vector.broadcast %140 : f32 to vector<16x16xf32>
    %142 = arith.mulf %139, %141 : vector<16x16xf32>
    %143 = arith.addf %137, %142 : vector<16x16xf32>
    %144 = vector.extract_strided_slice %8 {offsets = [7, 0, 0], sizes = [1, 16, 16], strides = [1, 1, 1]} : vector<8x16x16xf32> to vector<1x16x16xf32>
    %145 = vector.shape_cast %144 : vector<1x16x16xf32> to vector<16x16xf32>
    %c2_42 = arith.constant 2 : index
    %c7_43 = arith.constant 7 : index
    %146 = memref.load %arg3[%c2_42, %c7_43] : memref<4x8xf32, #tpu.memory_space<smem>>
    %147 = vector.broadcast %146 : f32 to vector<16x16xf32>
    %148 = arith.mulf %145, %147 : vector<16x16xf32>
    %149 = arith.addf %143, %148 : vector<16x16xf32>
    %150 = vector.extract_strided_slice %8 {offsets = [0, 0, 0], sizes = [1, 16, 16], strides = [1, 1, 1]} : vector<8x16x16xf32> to vector<1x16x16xf32>
    %151 = vector.shape_cast %150 : vector<1x16x16xf32> to vector<16x16xf32>
    %c3_44 = arith.constant 3 : index
    %c0_45 = arith.constant 0 : index
    %152 = memref.load %arg3[%c3_44, %c0_45] : memref<4x8xf32, #tpu.memory_space<smem>>
    %153 = vector.broadcast %152 : f32 to vector<16x16xf32>
    %154 = arith.mulf %151, %153 : vector<16x16xf32>
    %155 = vector.extract_strided_slice %8 {offsets = [1, 0, 0], sizes = [1, 16, 16], strides = [1, 1, 1]} : vector<8x16x16xf32> to vector<1x16x16xf32>
    %156 = vector.shape_cast %155 : vector<1x16x16xf32> to vector<16x16xf32>
    %c3_46 = arith.constant 3 : index
    %c1_47 = arith.constant 1 : index
    %157 = memref.load %arg3[%c3_46, %c1_47] : memref<4x8xf32, #tpu.memory_space<smem>>
    %158 = vector.broadcast %157 : f32 to vector<16x16xf32>
    %159 = arith.mulf %156, %158 : vector<16x16xf32>
    %160 = arith.addf %154, %159 : vector<16x16xf32>
    %161 = vector.extract_strided_slice %8 {offsets = [2, 0, 0], sizes = [1, 16, 16], strides = [1, 1, 1]} : vector<8x16x16xf32> to vector<1x16x16xf32>
    %162 = vector.shape_cast %161 : vector<1x16x16xf32> to vector<16x16xf32>
    %c3_48 = arith.constant 3 : index
    %c2_49 = arith.constant 2 : index
    %163 = memref.load %arg3[%c3_48, %c2_49] : memref<4x8xf32, #tpu.memory_space<smem>>
    %164 = vector.broadcast %163 : f32 to vector<16x16xf32>
    %165 = arith.mulf %162, %164 : vector<16x16xf32>
    %166 = arith.addf %160, %165 : vector<16x16xf32>
    %167 = vector.extract_strided_slice %8 {offsets = [3, 0, 0], sizes = [1, 16, 16], strides = [1, 1, 1]} : vector<8x16x16xf32> to vector<1x16x16xf32>
    %168 = vector.shape_cast %167 : vector<1x16x16xf32> to vector<16x16xf32>
    %c3_50 = arith.constant 3 : index
    %c3_51 = arith.constant 3 : index
    %169 = memref.load %arg3[%c3_50, %c3_51] : memref<4x8xf32, #tpu.memory_space<smem>>
    %170 = vector.broadcast %169 : f32 to vector<16x16xf32>
    %171 = arith.mulf %168, %170 : vector<16x16xf32>
    %172 = arith.addf %166, %171 : vector<16x16xf32>
    %173 = vector.extract_strided_slice %8 {offsets = [4, 0, 0], sizes = [1, 16, 16], strides = [1, 1, 1]} : vector<8x16x16xf32> to vector<1x16x16xf32>
    %174 = vector.shape_cast %173 : vector<1x16x16xf32> to vector<16x16xf32>
    %c3_52 = arith.constant 3 : index
    %c4_53 = arith.constant 4 : index
    %175 = memref.load %arg3[%c3_52, %c4_53] : memref<4x8xf32, #tpu.memory_space<smem>>
    %176 = vector.broadcast %175 : f32 to vector<16x16xf32>
    %177 = arith.mulf %174, %176 : vector<16x16xf32>
    %178 = arith.addf %172, %177 : vector<16x16xf32>
    %179 = vector.extract_strided_slice %8 {offsets = [5, 0, 0], sizes = [1, 16, 16], strides = [1, 1, 1]} : vector<8x16x16xf32> to vector<1x16x16xf32>
    %180 = vector.shape_cast %179 : vector<1x16x16xf32> to vector<16x16xf32>
    %c3_54 = arith.constant 3 : index
    %c5_55 = arith.constant 5 : index
    %181 = memref.load %arg3[%c3_54, %c5_55] : memref<4x8xf32, #tpu.memory_space<smem>>
    %182 = vector.broadcast %181 : f32 to vector<16x16xf32>
    %183 = arith.mulf %180, %182 : vector<16x16xf32>
    %184 = arith.addf %178, %183 : vector<16x16xf32>
    %185 = vector.extract_strided_slice %8 {offsets = [6, 0, 0], sizes = [1, 16, 16], strides = [1, 1, 1]} : vector<8x16x16xf32> to vector<1x16x16xf32>
    %186 = vector.shape_cast %185 : vector<1x16x16xf32> to vector<16x16xf32>
    %c3_56 = arith.constant 3 : index
    %c6_57 = arith.constant 6 : index
    %187 = memref.load %arg3[%c3_56, %c6_57] : memref<4x8xf32, #tpu.memory_space<smem>>
    %188 = vector.broadcast %187 : f32 to vector<16x16xf32>
    %189 = arith.mulf %186, %188 : vector<16x16xf32>
    %190 = arith.addf %184, %189 : vector<16x16xf32>
    %191 = vector.extract_strided_slice %8 {offsets = [7, 0, 0], sizes = [1, 16, 16], strides = [1, 1, 1]} : vector<8x16x16xf32> to vector<1x16x16xf32>
    %192 = vector.shape_cast %191 : vector<1x16x16xf32> to vector<16x16xf32>
    %c3_58 = arith.constant 3 : index
    %c7_59 = arith.constant 7 : index
    %193 = memref.load %arg3[%c3_58, %c7_59] : memref<4x8xf32, #tpu.memory_space<smem>>
    %194 = vector.broadcast %193 : f32 to vector<16x16xf32>
    %195 = arith.mulf %192, %194 : vector<16x16xf32>
    %196 = arith.addf %190, %195 : vector<16x16xf32>
    %197 = vector.shape_cast %55 : vector<16x16xf32> to vector<1x16x16xf32>
    %198 = vector.shape_cast %102 : vector<16x16xf32> to vector<1x16x16xf32>
    %199 = vector.shape_cast %149 : vector<16x16xf32> to vector<1x16x16xf32>
    %200 = vector.shape_cast %196 : vector<16x16xf32> to vector<1x16x16xf32>
    %201 = tpu.concatenate %197, %198, %199, %200 in 0 : vector<1x16x16xf32>, vector<1x16x16xf32>, vector<1x16x16xf32>, vector<1x16x16xf32> -> vector<4x16x16xf32>
    %c0_60 = arith.constant 0 : index
    %c0_61 = arith.constant 0 : index
    %202 = arith.index_cast %3 : i32 to index
    %c0_62 = arith.constant 0 : index
    %203 = vector.load %arg2[%c0_60, %c0_61, %202, %c0_62] : memref<1x8x16x16xf32, #tpu.memory_space<vmem>>, vector<1x8x1x16xf32>
    %204 = vector.shape_cast %203 : vector<1x8x1x16xf32> to vector<8x1x16xf32>
    %205 = vector.extract_strided_slice %204 {offsets = [0, 0, 0], sizes = [1, 1, 16], strides = [1, 1, 1]} : vector<8x1x16xf32> to vector<1x1x16xf32>
    %206 = vector.shape_cast %205 : vector<1x1x16xf32> to vector<1x16xf32>
    %c0_63 = arith.constant 0 : index
    %c0_64 = arith.constant 0 : index
    %207 = memref.load %arg3[%c0_63, %c0_64] : memref<4x8xf32, #tpu.memory_space<smem>>
    %208 = vector.broadcast %207 : f32 to vector<1x16xf32>
    %209 = arith.mulf %206, %208 : vector<1x16xf32>
    %210 = vector.extract_strided_slice %204 {offsets = [1, 0, 0], sizes = [1, 1, 16], strides = [1, 1, 1]} : vector<8x1x16xf32> to vector<1x1x16xf32>
    %211 = vector.shape_cast %210 : vector<1x1x16xf32> to vector<1x16xf32>
    %c0_65 = arith.constant 0 : index
    %c1_66 = arith.constant 1 : index
    %212 = memref.load %arg3[%c0_65, %c1_66] : memref<4x8xf32, #tpu.memory_space<smem>>
    %213 = vector.broadcast %212 : f32 to vector<1x16xf32>
    %214 = arith.mulf %211, %213 : vector<1x16xf32>
    %215 = arith.addf %209, %214 : vector<1x16xf32>
    %216 = vector.extract_strided_slice %204 {offsets = [2, 0, 0], sizes = [1, 1, 16], strides = [1, 1, 1]} : vector<8x1x16xf32> to vector<1x1x16xf32>
    %217 = vector.shape_cast %216 : vector<1x1x16xf32> to vector<1x16xf32>
    %c0_67 = arith.constant 0 : index
    %c2_68 = arith.constant 2 : index
    %218 = memref.load %arg3[%c0_67, %c2_68] : memref<4x8xf32, #tpu.memory_space<smem>>
    %219 = vector.broadcast %218 : f32 to vector<1x16xf32>
    %220 = arith.mulf %217, %219 : vector<1x16xf32>
    %221 = arith.addf %215, %220 : vector<1x16xf32>
    %222 = vector.extract_strided_slice %204 {offsets = [3, 0, 0], sizes = [1, 1, 16], strides = [1, 1, 1]} : vector<8x1x16xf32> to vector<1x1x16xf32>
    %223 = vector.shape_cast %222 : vector<1x1x16xf32> to vector<1x16xf32>
    %c0_69 = arith.constant 0 : index
    %c3_70 = arith.constant 3 : index
    %224 = memref.load %arg3[%c0_69, %c3_70] : memref<4x8xf32, #tpu.memory_space<smem>>
    %225 = vector.broadcast %224 : f32 to vector<1x16xf32>
    %226 = arith.mulf %223, %225 : vector<1x16xf32>
    %227 = arith.addf %221, %226 : vector<1x16xf32>
    %228 = vector.extract_strided_slice %204 {offsets = [4, 0, 0], sizes = [1, 1, 16], strides = [1, 1, 1]} : vector<8x1x16xf32> to vector<1x1x16xf32>
    %229 = vector.shape_cast %228 : vector<1x1x16xf32> to vector<1x16xf32>
    %c0_71 = arith.constant 0 : index
    %c4_72 = arith.constant 4 : index
    %230 = memref.load %arg3[%c0_71, %c4_72] : memref<4x8xf32, #tpu.memory_space<smem>>
    %231 = vector.broadcast %230 : f32 to vector<1x16xf32>
    %232 = arith.mulf %229, %231 : vector<1x16xf32>
    %233 = arith.addf %227, %232 : vector<1x16xf32>
    %234 = vector.extract_strided_slice %204 {offsets = [5, 0, 0], sizes = [1, 1, 16], strides = [1, 1, 1]} : vector<8x1x16xf32> to vector<1x1x16xf32>
    %235 = vector.shape_cast %234 : vector<1x1x16xf32> to vector<1x16xf32>
    %c0_73 = arith.constant 0 : index
    %c5_74 = arith.constant 5 : index
    %236 = memref.load %arg3[%c0_73, %c5_74] : memref<4x8xf32, #tpu.memory_space<smem>>
    %237 = vector.broadcast %236 : f32 to vector<1x16xf32>
    %238 = arith.mulf %235, %237 : vector<1x16xf32>
    %239 = arith.addf %233, %238 : vector<1x16xf32>
    %240 = vector.extract_strided_slice %204 {offsets = [6, 0, 0], sizes = [1, 1, 16], strides = [1, 1, 1]} : vector<8x1x16xf32> to vector<1x1x16xf32>
    %241 = vector.shape_cast %240 : vector<1x1x16xf32> to vector<1x16xf32>
    %c0_75 = arith.constant 0 : index
    %c6_76 = arith.constant 6 : index
    %242 = memref.load %arg3[%c0_75, %c6_76] : memref<4x8xf32, #tpu.memory_space<smem>>
    %243 = vector.broadcast %242 : f32 to vector<1x16xf32>
    %244 = arith.mulf %241, %243 : vector<1x16xf32>
    %245 = arith.addf %239, %244 : vector<1x16xf32>
    %246 = vector.extract_strided_slice %204 {offsets = [7, 0, 0], sizes = [1, 1, 16], strides = [1, 1, 1]} : vector<8x1x16xf32> to vector<1x1x16xf32>
    %247 = vector.shape_cast %246 : vector<1x1x16xf32> to vector<1x16xf32>
    %c0_77 = arith.constant 0 : index
    %c7_78 = arith.constant 7 : index
    %248 = memref.load %arg3[%c0_77, %c7_78] : memref<4x8xf32, #tpu.memory_space<smem>>
    %249 = vector.broadcast %248 : f32 to vector<1x16xf32>
    %250 = arith.mulf %247, %249 : vector<1x16xf32>
    %251 = arith.addf %245, %250 : vector<1x16xf32>
    %252 = vector.extract_strided_slice %204 {offsets = [0, 0, 0], sizes = [1, 1, 16], strides = [1, 1, 1]} : vector<8x1x16xf32> to vector<1x1x16xf32>
    %253 = vector.shape_cast %252 : vector<1x1x16xf32> to vector<1x16xf32>
    %c1_79 = arith.constant 1 : index
    %c0_80 = arith.constant 0 : index
    %254 = memref.load %arg3[%c1_79, %c0_80] : memref<4x8xf32, #tpu.memory_space<smem>>
    %255 = vector.broadcast %254 : f32 to vector<1x16xf32>
    %256 = arith.mulf %253, %255 : vector<1x16xf32>
    %257 = vector.extract_strided_slice %204 {offsets = [1, 0, 0], sizes = [1, 1, 16], strides = [1, 1, 1]} : vector<8x1x16xf32> to vector<1x1x16xf32>
    %258 = vector.shape_cast %257 : vector<1x1x16xf32> to vector<1x16xf32>
    %c1_81 = arith.constant 1 : index
    %c1_82 = arith.constant 1 : index
    %259 = memref.load %arg3[%c1_81, %c1_82] : memref<4x8xf32, #tpu.memory_space<smem>>
    %260 = vector.broadcast %259 : f32 to vector<1x16xf32>
    %261 = arith.mulf %258, %260 : vector<1x16xf32>
    %262 = arith.addf %256, %261 : vector<1x16xf32>
    %263 = vector.extract_strided_slice %204 {offsets = [2, 0, 0], sizes = [1, 1, 16], strides = [1, 1, 1]} : vector<8x1x16xf32> to vector<1x1x16xf32>
    %264 = vector.shape_cast %263 : vector<1x1x16xf32> to vector<1x16xf32>
    %c1_83 = arith.constant 1 : index
    %c2_84 = arith.constant 2 : index
    %265 = memref.load %arg3[%c1_83, %c2_84] : memref<4x8xf32, #tpu.memory_space<smem>>
    %266 = vector.broadcast %265 : f32 to vector<1x16xf32>
    %267 = arith.mulf %264, %266 : vector<1x16xf32>
    %268 = arith.addf %262, %267 : vector<1x16xf32>
    %269 = vector.extract_strided_slice %204 {offsets = [3, 0, 0], sizes = [1, 1, 16], strides = [1, 1, 1]} : vector<8x1x16xf32> to vector<1x1x16xf32>
    %270 = vector.shape_cast %269 : vector<1x1x16xf32> to vector<1x16xf32>
    %c1_85 = arith.constant 1 : index
    %c3_86 = arith.constant 3 : index
    %271 = memref.load %arg3[%c1_85, %c3_86] : memref<4x8xf32, #tpu.memory_space<smem>>
    %272 = vector.broadcast %271 : f32 to vector<1x16xf32>
    %273 = arith.mulf %270, %272 : vector<1x16xf32>
    %274 = arith.addf %268, %273 : vector<1x16xf32>
    %275 = vector.extract_strided_slice %204 {offsets = [4, 0, 0], sizes = [1, 1, 16], strides = [1, 1, 1]} : vector<8x1x16xf32> to vector<1x1x16xf32>
    %276 = vector.shape_cast %275 : vector<1x1x16xf32> to vector<1x16xf32>
    %c1_87 = arith.constant 1 : index
    %c4_88 = arith.constant 4 : index
    %277 = memref.load %arg3[%c1_87, %c4_88] : memref<4x8xf32, #tpu.memory_space<smem>>
    %278 = vector.broadcast %277 : f32 to vector<1x16xf32>
    %279 = arith.mulf %276, %278 : vector<1x16xf32>
    %280 = arith.addf %274, %279 : vector<1x16xf32>
    %281 = vector.extract_strided_slice %204 {offsets = [5, 0, 0], sizes = [1, 1, 16], strides = [1, 1, 1]} : vector<8x1x16xf32> to vector<1x1x16xf32>
    %282 = vector.shape_cast %281 : vector<1x1x16xf32> to vector<1x16xf32>
    %c1_89 = arith.constant 1 : index
    %c5_90 = arith.constant 5 : index
    %283 = memref.load %arg3[%c1_89, %c5_90] : memref<4x8xf32, #tpu.memory_space<smem>>
    %284 = vector.broadcast %283 : f32 to vector<1x16xf32>
    %285 = arith.mulf %282, %284 : vector<1x16xf32>
    %286 = arith.addf %280, %285 : vector<1x16xf32>
    %287 = vector.extract_strided_slice %204 {offsets = [6, 0, 0], sizes = [1, 1, 16], strides = [1, 1, 1]} : vector<8x1x16xf32> to vector<1x1x16xf32>
    %288 = vector.shape_cast %287 : vector<1x1x16xf32> to vector<1x16xf32>
    %c1_91 = arith.constant 1 : index
    %c6_92 = arith.constant 6 : index
    %289 = memref.load %arg3[%c1_91, %c6_92] : memref<4x8xf32, #tpu.memory_space<smem>>
    %290 = vector.broadcast %289 : f32 to vector<1x16xf32>
    %291 = arith.mulf %288, %290 : vector<1x16xf32>
    %292 = arith.addf %286, %291 : vector<1x16xf32>
    %293 = vector.extract_strided_slice %204 {offsets = [7, 0, 0], sizes = [1, 1, 16], strides = [1, 1, 1]} : vector<8x1x16xf32> to vector<1x1x16xf32>
    %294 = vector.shape_cast %293 : vector<1x1x16xf32> to vector<1x16xf32>
    %c1_93 = arith.constant 1 : index
    %c7_94 = arith.constant 7 : index
    %295 = memref.load %arg3[%c1_93, %c7_94] : memref<4x8xf32, #tpu.memory_space<smem>>
    %296 = vector.broadcast %295 : f32 to vector<1x16xf32>
    %297 = arith.mulf %294, %296 : vector<1x16xf32>
    %298 = arith.addf %292, %297 : vector<1x16xf32>
    %299 = vector.extract_strided_slice %204 {offsets = [0, 0, 0], sizes = [1, 1, 16], strides = [1, 1, 1]} : vector<8x1x16xf32> to vector<1x1x16xf32>
    %300 = vector.shape_cast %299 : vector<1x1x16xf32> to vector<1x16xf32>
    %c2_95 = arith.constant 2 : index
    %c0_96 = arith.constant 0 : index
    %301 = memref.load %arg3[%c2_95, %c0_96] : memref<4x8xf32, #tpu.memory_space<smem>>
    %302 = vector.broadcast %301 : f32 to vector<1x16xf32>
    %303 = arith.mulf %300, %302 : vector<1x16xf32>
    %304 = vector.extract_strided_slice %204 {offsets = [1, 0, 0], sizes = [1, 1, 16], strides = [1, 1, 1]} : vector<8x1x16xf32> to vector<1x1x16xf32>
    %305 = vector.shape_cast %304 : vector<1x1x16xf32> to vector<1x16xf32>
    %c2_97 = arith.constant 2 : index
    %c1_98 = arith.constant 1 : index
    %306 = memref.load %arg3[%c2_97, %c1_98] : memref<4x8xf32, #tpu.memory_space<smem>>
    %307 = vector.broadcast %306 : f32 to vector<1x16xf32>
    %308 = arith.mulf %305, %307 : vector<1x16xf32>
    %309 = arith.addf %303, %308 : vector<1x16xf32>
    %310 = vector.extract_strided_slice %204 {offsets = [2, 0, 0], sizes = [1, 1, 16], strides = [1, 1, 1]} : vector<8x1x16xf32> to vector<1x1x16xf32>
    %311 = vector.shape_cast %310 : vector<1x1x16xf32> to vector<1x16xf32>
    %c2_99 = arith.constant 2 : index
    %c2_100 = arith.constant 2 : index
    %312 = memref.load %arg3[%c2_99, %c2_100] : memref<4x8xf32, #tpu.memory_space<smem>>
    %313 = vector.broadcast %312 : f32 to vector<1x16xf32>
    %314 = arith.mulf %311, %313 : vector<1x16xf32>
    %315 = arith.addf %309, %314 : vector<1x16xf32>
    %316 = vector.extract_strided_slice %204 {offsets = [3, 0, 0], sizes = [1, 1, 16], strides = [1, 1, 1]} : vector<8x1x16xf32> to vector<1x1x16xf32>
    %317 = vector.shape_cast %316 : vector<1x1x16xf32> to vector<1x16xf32>
    %c2_101 = arith.constant 2 : index
    %c3_102 = arith.constant 3 : index
    %318 = memref.load %arg3[%c2_101, %c3_102] : memref<4x8xf32, #tpu.memory_space<smem>>
    %319 = vector.broadcast %318 : f32 to vector<1x16xf32>
    %320 = arith.mulf %317, %319 : vector<1x16xf32>
    %321 = arith.addf %315, %320 : vector<1x16xf32>
    %322 = vector.extract_strided_slice %204 {offsets = [4, 0, 0], sizes = [1, 1, 16], strides = [1, 1, 1]} : vector<8x1x16xf32> to vector<1x1x16xf32>
    %323 = vector.shape_cast %322 : vector<1x1x16xf32> to vector<1x16xf32>
    %c2_103 = arith.constant 2 : index
    %c4_104 = arith.constant 4 : index
    %324 = memref.load %arg3[%c2_103, %c4_104] : memref<4x8xf32, #tpu.memory_space<smem>>
    %325 = vector.broadcast %324 : f32 to vector<1x16xf32>
    %326 = arith.mulf %323, %325 : vector<1x16xf32>
    %327 = arith.addf %321, %326 : vector<1x16xf32>
    %328 = vector.extract_strided_slice %204 {offsets = [5, 0, 0], sizes = [1, 1, 16], strides = [1, 1, 1]} : vector<8x1x16xf32> to vector<1x1x16xf32>
    %329 = vector.shape_cast %328 : vector<1x1x16xf32> to vector<1x16xf32>
    %c2_105 = arith.constant 2 : index
    %c5_106 = arith.constant 5 : index
    %330 = memref.load %arg3[%c2_105, %c5_106] : memref<4x8xf32, #tpu.memory_space<smem>>
    %331 = vector.broadcast %330 : f32 to vector<1x16xf32>
    %332 = arith.mulf %329, %331 : vector<1x16xf32>
    %333 = arith.addf %327, %332 : vector<1x16xf32>
    %334 = vector.extract_strided_slice %204 {offsets = [6, 0, 0], sizes = [1, 1, 16], strides = [1, 1, 1]} : vector<8x1x16xf32> to vector<1x1x16xf32>
    %335 = vector.shape_cast %334 : vector<1x1x16xf32> to vector<1x16xf32>
    %c2_107 = arith.constant 2 : index
    %c6_108 = arith.constant 6 : index
    %336 = memref.load %arg3[%c2_107, %c6_108] : memref<4x8xf32, #tpu.memory_space<smem>>
    %337 = vector.broadcast %336 : f32 to vector<1x16xf32>
    %338 = arith.mulf %335, %337 : vector<1x16xf32>
    %339 = arith.addf %333, %338 : vector<1x16xf32>
    %340 = vector.extract_strided_slice %204 {offsets = [7, 0, 0], sizes = [1, 1, 16], strides = [1, 1, 1]} : vector<8x1x16xf32> to vector<1x1x16xf32>
    %341 = vector.shape_cast %340 : vector<1x1x16xf32> to vector<1x16xf32>
    %c2_109 = arith.constant 2 : index
    %c7_110 = arith.constant 7 : index
    %342 = memref.load %arg3[%c2_109, %c7_110] : memref<4x8xf32, #tpu.memory_space<smem>>
    %343 = vector.broadcast %342 : f32 to vector<1x16xf32>
    %344 = arith.mulf %341, %343 : vector<1x16xf32>
    %345 = arith.addf %339, %344 : vector<1x16xf32>
    %346 = vector.extract_strided_slice %204 {offsets = [0, 0, 0], sizes = [1, 1, 16], strides = [1, 1, 1]} : vector<8x1x16xf32> to vector<1x1x16xf32>
    %347 = vector.shape_cast %346 : vector<1x1x16xf32> to vector<1x16xf32>
    %c3_111 = arith.constant 3 : index
    %c0_112 = arith.constant 0 : index
    %348 = memref.load %arg3[%c3_111, %c0_112] : memref<4x8xf32, #tpu.memory_space<smem>>
    %349 = vector.broadcast %348 : f32 to vector<1x16xf32>
    %350 = arith.mulf %347, %349 : vector<1x16xf32>
    %351 = vector.extract_strided_slice %204 {offsets = [1, 0, 0], sizes = [1, 1, 16], strides = [1, 1, 1]} : vector<8x1x16xf32> to vector<1x1x16xf32>
    %352 = vector.shape_cast %351 : vector<1x1x16xf32> to vector<1x16xf32>
    %c3_113 = arith.constant 3 : index
    %c1_114 = arith.constant 1 : index
    %353 = memref.load %arg3[%c3_113, %c1_114] : memref<4x8xf32, #tpu.memory_space<smem>>
    %354 = vector.broadcast %353 : f32 to vector<1x16xf32>
    %355 = arith.mulf %352, %354 : vector<1x16xf32>
    %356 = arith.addf %350, %355 : vector<1x16xf32>
    %357 = vector.extract_strided_slice %204 {offsets = [2, 0, 0], sizes = [1, 1, 16], strides = [1, 1, 1]} : vector<8x1x16xf32> to vector<1x1x16xf32>
    %358 = vector.shape_cast %357 : vector<1x1x16xf32> to vector<1x16xf32>
    %c3_115 = arith.constant 3 : index
    %c2_116 = arith.constant 2 : index
    %359 = memref.load %arg3[%c3_115, %c2_116] : memref<4x8xf32, #tpu.memory_space<smem>>
    %360 = vector.broadcast %359 : f32 to vector<1x16xf32>
    %361 = arith.mulf %358, %360 : vector<1x16xf32>
    %362 = arith.addf %356, %361 : vector<1x16xf32>
    %363 = vector.extract_strided_slice %204 {offsets = [3, 0, 0], sizes = [1, 1, 16], strides = [1, 1, 1]} : vector<8x1x16xf32> to vector<1x1x16xf32>
    %364 = vector.shape_cast %363 : vector<1x1x16xf32> to vector<1x16xf32>
    %c3_117 = arith.constant 3 : index
    %c3_118 = arith.constant 3 : index
    %365 = memref.load %arg3[%c3_117, %c3_118] : memref<4x8xf32, #tpu.memory_space<smem>>
    %366 = vector.broadcast %365 : f32 to vector<1x16xf32>
    %367 = arith.mulf %364, %366 : vector<1x16xf32>
    %368 = arith.addf %362, %367 : vector<1x16xf32>
    %369 = vector.extract_strided_slice %204 {offsets = [4, 0, 0], sizes = [1, 1, 16], strides = [1, 1, 1]} : vector<8x1x16xf32> to vector<1x1x16xf32>
    %370 = vector.shape_cast %369 : vector<1x1x16xf32> to vector<1x16xf32>
    %c3_119 = arith.constant 3 : index
    %c4_120 = arith.constant 4 : index
    %371 = memref.load %arg3[%c3_119, %c4_120] : memref<4x8xf32, #tpu.memory_space<smem>>
    %372 = vector.broadcast %371 : f32 to vector<1x16xf32>
    %373 = arith.mulf %370, %372 : vector<1x16xf32>
    %374 = arith.addf %368, %373 : vector<1x16xf32>
    %375 = vector.extract_strided_slice %204 {offsets = [5, 0, 0], sizes = [1, 1, 16], strides = [1, 1, 1]} : vector<8x1x16xf32> to vector<1x1x16xf32>
    %376 = vector.shape_cast %375 : vector<1x1x16xf32> to vector<1x16xf32>
    %c3_121 = arith.constant 3 : index
    %c5_122 = arith.constant 5 : index
    %377 = memref.load %arg3[%c3_121, %c5_122] : memref<4x8xf32, #tpu.memory_space<smem>>
    %378 = vector.broadcast %377 : f32 to vector<1x16xf32>
    %379 = arith.mulf %376, %378 : vector<1x16xf32>
    %380 = arith.addf %374, %379 : vector<1x16xf32>
    %381 = vector.extract_strided_slice %204 {offsets = [6, 0, 0], sizes = [1, 1, 16], strides = [1, 1, 1]} : vector<8x1x16xf32> to vector<1x1x16xf32>
    %382 = vector.shape_cast %381 : vector<1x1x16xf32> to vector<1x16xf32>
    %c3_123 = arith.constant 3 : index
    %c6_124 = arith.constant 6 : index
    %383 = memref.load %arg3[%c3_123, %c6_124] : memref<4x8xf32, #tpu.memory_space<smem>>
    %384 = vector.broadcast %383 : f32 to vector<1x16xf32>
    %385 = arith.mulf %382, %384 : vector<1x16xf32>
    %386 = arith.addf %380, %385 : vector<1x16xf32>
    %387 = vector.extract_strided_slice %204 {offsets = [7, 0, 0], sizes = [1, 1, 16], strides = [1, 1, 1]} : vector<8x1x16xf32> to vector<1x1x16xf32>
    %388 = vector.shape_cast %387 : vector<1x1x16xf32> to vector<1x16xf32>
    %c3_125 = arith.constant 3 : index
    %c7_126 = arith.constant 7 : index
    %389 = memref.load %arg3[%c3_125, %c7_126] : memref<4x8xf32, #tpu.memory_space<smem>>
    %390 = vector.broadcast %389 : f32 to vector<1x16xf32>
    %391 = arith.mulf %388, %390 : vector<1x16xf32>
    %392 = arith.addf %386, %391 : vector<1x16xf32>
    %393 = vector.shape_cast %251 : vector<1x16xf32> to vector<1x1x16xf32>
    %394 = vector.shape_cast %298 : vector<1x16xf32> to vector<1x1x16xf32>
    %395 = vector.shape_cast %345 : vector<1x16xf32> to vector<1x1x16xf32>
    %396 = vector.shape_cast %392 : vector<1x16xf32> to vector<1x1x16xf32>
    %397 = tpu.concatenate %393, %394, %395, %396 in 0 : vector<1x1x16xf32>, vector<1x1x16xf32>, vector<1x1x16xf32>, vector<1x1x16xf32> -> vector<4x1x16xf32>
    %c0_127 = arith.constant 0 : index
    %c0_128 = arith.constant 0 : index
    %398 = arith.index_cast %5 : i32 to index
    %c0_129 = arith.constant 0 : index
    %399 = vector.load %arg2[%c0_127, %c0_128, %398, %c0_129] : memref<1x8x16x16xf32, #tpu.memory_space<vmem>>, vector<1x8x1x16xf32>
    %400 = vector.shape_cast %399 : vector<1x8x1x16xf32> to vector<8x1x16xf32>
    %401 = vector.extract_strided_slice %400 {offsets = [0, 0, 0], sizes = [1, 1, 16], strides = [1, 1, 1]} : vector<8x1x16xf32> to vector<1x1x16xf32>
    %402 = vector.shape_cast %401 : vector<1x1x16xf32> to vector<1x16xf32>
    %c0_130 = arith.constant 0 : index
    %c0_131 = arith.constant 0 : index
    %403 = memref.load %arg3[%c0_130, %c0_131] : memref<4x8xf32, #tpu.memory_space<smem>>
    %404 = vector.broadcast %403 : f32 to vector<1x16xf32>
    %405 = arith.mulf %402, %404 : vector<1x16xf32>
    %406 = vector.extract_strided_slice %400 {offsets = [1, 0, 0], sizes = [1, 1, 16], strides = [1, 1, 1]} : vector<8x1x16xf32> to vector<1x1x16xf32>
    %407 = vector.shape_cast %406 : vector<1x1x16xf32> to vector<1x16xf32>
    %c0_132 = arith.constant 0 : index
    %c1_133 = arith.constant 1 : index
    %408 = memref.load %arg3[%c0_132, %c1_133] : memref<4x8xf32, #tpu.memory_space<smem>>
    %409 = vector.broadcast %408 : f32 to vector<1x16xf32>
    %410 = arith.mulf %407, %409 : vector<1x16xf32>
    %411 = arith.addf %405, %410 : vector<1x16xf32>
    %412 = vector.extract_strided_slice %400 {offsets = [2, 0, 0], sizes = [1, 1, 16], strides = [1, 1, 1]} : vector<8x1x16xf32> to vector<1x1x16xf32>
    %413 = vector.shape_cast %412 : vector<1x1x16xf32> to vector<1x16xf32>
    %c0_134 = arith.constant 0 : index
    %c2_135 = arith.constant 2 : index
    %414 = memref.load %arg3[%c0_134, %c2_135] : memref<4x8xf32, #tpu.memory_space<smem>>
    %415 = vector.broadcast %414 : f32 to vector<1x16xf32>
    %416 = arith.mulf %413, %415 : vector<1x16xf32>
    %417 = arith.addf %411, %416 : vector<1x16xf32>
    %418 = vector.extract_strided_slice %400 {offsets = [3, 0, 0], sizes = [1, 1, 16], strides = [1, 1, 1]} : vector<8x1x16xf32> to vector<1x1x16xf32>
    %419 = vector.shape_cast %418 : vector<1x1x16xf32> to vector<1x16xf32>
    %c0_136 = arith.constant 0 : index
    %c3_137 = arith.constant 3 : index
    %420 = memref.load %arg3[%c0_136, %c3_137] : memref<4x8xf32, #tpu.memory_space<smem>>
    %421 = vector.broadcast %420 : f32 to vector<1x16xf32>
    %422 = arith.mulf %419, %421 : vector<1x16xf32>
    %423 = arith.addf %417, %422 : vector<1x16xf32>
    %424 = vector.extract_strided_slice %400 {offsets = [4, 0, 0], sizes = [1, 1, 16], strides = [1, 1, 1]} : vector<8x1x16xf32> to vector<1x1x16xf32>
    %425 = vector.shape_cast %424 : vector<1x1x16xf32> to vector<1x16xf32>
    %c0_138 = arith.constant 0 : index
    %c4_139 = arith.constant 4 : index
    %426 = memref.load %arg3[%c0_138, %c4_139] : memref<4x8xf32, #tpu.memory_space<smem>>
    %427 = vector.broadcast %426 : f32 to vector<1x16xf32>
    %428 = arith.mulf %425, %427 : vector<1x16xf32>
    %429 = arith.addf %423, %428 : vector<1x16xf32>
    %430 = vector.extract_strided_slice %400 {offsets = [5, 0, 0], sizes = [1, 1, 16], strides = [1, 1, 1]} : vector<8x1x16xf32> to vector<1x1x16xf32>
    %431 = vector.shape_cast %430 : vector<1x1x16xf32> to vector<1x16xf32>
    %c0_140 = arith.constant 0 : index
    %c5_141 = arith.constant 5 : index
    %432 = memref.load %arg3[%c0_140, %c5_141] : memref<4x8xf32, #tpu.memory_space<smem>>
    %433 = vector.broadcast %432 : f32 to vector<1x16xf32>
    %434 = arith.mulf %431, %433 : vector<1x16xf32>
    %435 = arith.addf %429, %434 : vector<1x16xf32>
    %436 = vector.extract_strided_slice %400 {offsets = [6, 0, 0], sizes = [1, 1, 16], strides = [1, 1, 1]} : vector<8x1x16xf32> to vector<1x1x16xf32>
    %437 = vector.shape_cast %436 : vector<1x1x16xf32> to vector<1x16xf32>
    %c0_142 = arith.constant 0 : index
    %c6_143 = arith.constant 6 : index
    %438 = memref.load %arg3[%c0_142, %c6_143] : memref<4x8xf32, #tpu.memory_space<smem>>
    %439 = vector.broadcast %438 : f32 to vector<1x16xf32>
    %440 = arith.mulf %437, %439 : vector<1x16xf32>
    %441 = arith.addf %435, %440 : vector<1x16xf32>
    %442 = vector.extract_strided_slice %400 {offsets = [7, 0, 0], sizes = [1, 1, 16], strides = [1, 1, 1]} : vector<8x1x16xf32> to vector<1x1x16xf32>
    %443 = vector.shape_cast %442 : vector<1x1x16xf32> to vector<1x16xf32>
    %c0_144 = arith.constant 0 : index
    %c7_145 = arith.constant 7 : index
    %444 = memref.load %arg3[%c0_144, %c7_145] : memref<4x8xf32, #tpu.memory_space<smem>>
    %445 = vector.broadcast %444 : f32 to vector<1x16xf32>
    %446 = arith.mulf %443, %445 : vector<1x16xf32>
    %447 = arith.addf %441, %446 : vector<1x16xf32>
    %448 = vector.extract_strided_slice %400 {offsets = [0, 0, 0], sizes = [1, 1, 16], strides = [1, 1, 1]} : vector<8x1x16xf32> to vector<1x1x16xf32>
    %449 = vector.shape_cast %448 : vector<1x1x16xf32> to vector<1x16xf32>
    %c1_146 = arith.constant 1 : index
    %c0_147 = arith.constant 0 : index
    %450 = memref.load %arg3[%c1_146, %c0_147] : memref<4x8xf32, #tpu.memory_space<smem>>
    %451 = vector.broadcast %450 : f32 to vector<1x16xf32>
    %452 = arith.mulf %449, %451 : vector<1x16xf32>
    %453 = vector.extract_strided_slice %400 {offsets = [1, 0, 0], sizes = [1, 1, 16], strides = [1, 1, 1]} : vector<8x1x16xf32> to vector<1x1x16xf32>
    %454 = vector.shape_cast %453 : vector<1x1x16xf32> to vector<1x16xf32>
    %c1_148 = arith.constant 1 : index
    %c1_149 = arith.constant 1 : index
    %455 = memref.load %arg3[%c1_148, %c1_149] : memref<4x8xf32, #tpu.memory_space<smem>>
    %456 = vector.broadcast %455 : f32 to vector<1x16xf32>
    %457 = arith.mulf %454, %456 : vector<1x16xf32>
    %458 = arith.addf %452, %457 : vector<1x16xf32>
    %459 = vector.extract_strided_slice %400 {offsets = [2, 0, 0], sizes = [1, 1, 16], strides = [1, 1, 1]} : vector<8x1x16xf32> to vector<1x1x16xf32>
    %460 = vector.shape_cast %459 : vector<1x1x16xf32> to vector<1x16xf32>
    %c1_150 = arith.constant 1 : index
    %c2_151 = arith.constant 2 : index
    %461 = memref.load %arg3[%c1_150, %c2_151] : memref<4x8xf32, #tpu.memory_space<smem>>
    %462 = vector.broadcast %461 : f32 to vector<1x16xf32>
    %463 = arith.mulf %460, %462 : vector<1x16xf32>
    %464 = arith.addf %458, %463 : vector<1x16xf32>
    %465 = vector.extract_strided_slice %400 {offsets = [3, 0, 0], sizes = [1, 1, 16], strides = [1, 1, 1]} : vector<8x1x16xf32> to vector<1x1x16xf32>
    %466 = vector.shape_cast %465 : vector<1x1x16xf32> to vector<1x16xf32>
    %c1_152 = arith.constant 1 : index
    %c3_153 = arith.constant 3 : index
    %467 = memref.load %arg3[%c1_152, %c3_153] : memref<4x8xf32, #tpu.memory_space<smem>>
    %468 = vector.broadcast %467 : f32 to vector<1x16xf32>
    %469 = arith.mulf %466, %468 : vector<1x16xf32>
    %470 = arith.addf %464, %469 : vector<1x16xf32>
    %471 = vector.extract_strided_slice %400 {offsets = [4, 0, 0], sizes = [1, 1, 16], strides = [1, 1, 1]} : vector<8x1x16xf32> to vector<1x1x16xf32>
    %472 = vector.shape_cast %471 : vector<1x1x16xf32> to vector<1x16xf32>
    %c1_154 = arith.constant 1 : index
    %c4_155 = arith.constant 4 : index
    %473 = memref.load %arg3[%c1_154, %c4_155] : memref<4x8xf32, #tpu.memory_space<smem>>
    %474 = vector.broadcast %473 : f32 to vector<1x16xf32>
    %475 = arith.mulf %472, %474 : vector<1x16xf32>
    %476 = arith.addf %470, %475 : vector<1x16xf32>
    %477 = vector.extract_strided_slice %400 {offsets = [5, 0, 0], sizes = [1, 1, 16], strides = [1, 1, 1]} : vector<8x1x16xf32> to vector<1x1x16xf32>
    %478 = vector.shape_cast %477 : vector<1x1x16xf32> to vector<1x16xf32>
    %c1_156 = arith.constant 1 : index
    %c5_157 = arith.constant 5 : index
    %479 = memref.load %arg3[%c1_156, %c5_157] : memref<4x8xf32, #tpu.memory_space<smem>>
    %480 = vector.broadcast %479 : f32 to vector<1x16xf32>
    %481 = arith.mulf %478, %480 : vector<1x16xf32>
    %482 = arith.addf %476, %481 : vector<1x16xf32>
    %483 = vector.extract_strided_slice %400 {offsets = [6, 0, 0], sizes = [1, 1, 16], strides = [1, 1, 1]} : vector<8x1x16xf32> to vector<1x1x16xf32>
    %484 = vector.shape_cast %483 : vector<1x1x16xf32> to vector<1x16xf32>
    %c1_158 = arith.constant 1 : index
    %c6_159 = arith.constant 6 : index
    %485 = memref.load %arg3[%c1_158, %c6_159] : memref<4x8xf32, #tpu.memory_space<smem>>
    %486 = vector.broadcast %485 : f32 to vector<1x16xf32>
    %487 = arith.mulf %484, %486 : vector<1x16xf32>
    %488 = arith.addf %482, %487 : vector<1x16xf32>
    %489 = vector.extract_strided_slice %400 {offsets = [7, 0, 0], sizes = [1, 1, 16], strides = [1, 1, 1]} : vector<8x1x16xf32> to vector<1x1x16xf32>
    %490 = vector.shape_cast %489 : vector<1x1x16xf32> to vector<1x16xf32>
    %c1_160 = arith.constant 1 : index
    %c7_161 = arith.constant 7 : index
    %491 = memref.load %arg3[%c1_160, %c7_161] : memref<4x8xf32, #tpu.memory_space<smem>>
    %492 = vector.broadcast %491 : f32 to vector<1x16xf32>
    %493 = arith.mulf %490, %492 : vector<1x16xf32>
    %494 = arith.addf %488, %493 : vector<1x16xf32>
    %495 = vector.extract_strided_slice %400 {offsets = [0, 0, 0], sizes = [1, 1, 16], strides = [1, 1, 1]} : vector<8x1x16xf32> to vector<1x1x16xf32>
    %496 = vector.shape_cast %495 : vector<1x1x16xf32> to vector<1x16xf32>
    %c2_162 = arith.constant 2 : index
    %c0_163 = arith.constant 0 : index
    %497 = memref.load %arg3[%c2_162, %c0_163] : memref<4x8xf32, #tpu.memory_space<smem>>
    %498 = vector.broadcast %497 : f32 to vector<1x16xf32>
    %499 = arith.mulf %496, %498 : vector<1x16xf32>
    %500 = vector.extract_strided_slice %400 {offsets = [1, 0, 0], sizes = [1, 1, 16], strides = [1, 1, 1]} : vector<8x1x16xf32> to vector<1x1x16xf32>
    %501 = vector.shape_cast %500 : vector<1x1x16xf32> to vector<1x16xf32>
    %c2_164 = arith.constant 2 : index
    %c1_165 = arith.constant 1 : index
    %502 = memref.load %arg3[%c2_164, %c1_165] : memref<4x8xf32, #tpu.memory_space<smem>>
    %503 = vector.broadcast %502 : f32 to vector<1x16xf32>
    %504 = arith.mulf %501, %503 : vector<1x16xf32>
    %505 = arith.addf %499, %504 : vector<1x16xf32>
    %506 = vector.extract_strided_slice %400 {offsets = [2, 0, 0], sizes = [1, 1, 16], strides = [1, 1, 1]} : vector<8x1x16xf32> to vector<1x1x16xf32>
    %507 = vector.shape_cast %506 : vector<1x1x16xf32> to vector<1x16xf32>
    %c2_166 = arith.constant 2 : index
    %c2_167 = arith.constant 2 : index
    %508 = memref.load %arg3[%c2_166, %c2_167] : memref<4x8xf32, #tpu.memory_space<smem>>
    %509 = vector.broadcast %508 : f32 to vector<1x16xf32>
    %510 = arith.mulf %507, %509 : vector<1x16xf32>
    %511 = arith.addf %505, %510 : vector<1x16xf32>
    %512 = vector.extract_strided_slice %400 {offsets = [3, 0, 0], sizes = [1, 1, 16], strides = [1, 1, 1]} : vector<8x1x16xf32> to vector<1x1x16xf32>
    %513 = vector.shape_cast %512 : vector<1x1x16xf32> to vector<1x16xf32>
    %c2_168 = arith.constant 2 : index
    %c3_169 = arith.constant 3 : index
    %514 = memref.load %arg3[%c2_168, %c3_169] : memref<4x8xf32, #tpu.memory_space<smem>>
    %515 = vector.broadcast %514 : f32 to vector<1x16xf32>
    %516 = arith.mulf %513, %515 : vector<1x16xf32>
    %517 = arith.addf %511, %516 : vector<1x16xf32>
    %518 = vector.extract_strided_slice %400 {offsets = [4, 0, 0], sizes = [1, 1, 16], strides = [1, 1, 1]} : vector<8x1x16xf32> to vector<1x1x16xf32>
    %519 = vector.shape_cast %518 : vector<1x1x16xf32> to vector<1x16xf32>
    %c2_170 = arith.constant 2 : index
    %c4_171 = arith.constant 4 : index
    %520 = memref.load %arg3[%c2_170, %c4_171] : memref<4x8xf32, #tpu.memory_space<smem>>
    %521 = vector.broadcast %520 : f32 to vector<1x16xf32>
    %522 = arith.mulf %519, %521 : vector<1x16xf32>
    %523 = arith.addf %517, %522 : vector<1x16xf32>
    %524 = vector.extract_strided_slice %400 {offsets = [5, 0, 0], sizes = [1, 1, 16], strides = [1, 1, 1]} : vector<8x1x16xf32> to vector<1x1x16xf32>
    %525 = vector.shape_cast %524 : vector<1x1x16xf32> to vector<1x16xf32>
    %c2_172 = arith.constant 2 : index
    %c5_173 = arith.constant 5 : index
    %526 = memref.load %arg3[%c2_172, %c5_173] : memref<4x8xf32, #tpu.memory_space<smem>>
    %527 = vector.broadcast %526 : f32 to vector<1x16xf32>
    %528 = arith.mulf %525, %527 : vector<1x16xf32>
    %529 = arith.addf %523, %528 : vector<1x16xf32>
    %530 = vector.extract_strided_slice %400 {offsets = [6, 0, 0], sizes = [1, 1, 16], strides = [1, 1, 1]} : vector<8x1x16xf32> to vector<1x1x16xf32>
    %531 = vector.shape_cast %530 : vector<1x1x16xf32> to vector<1x16xf32>
    %c2_174 = arith.constant 2 : index
    %c6_175 = arith.constant 6 : index
    %532 = memref.load %arg3[%c2_174, %c6_175] : memref<4x8xf32, #tpu.memory_space<smem>>
    %533 = vector.broadcast %532 : f32 to vector<1x16xf32>
    %534 = arith.mulf %531, %533 : vector<1x16xf32>
    %535 = arith.addf %529, %534 : vector<1x16xf32>
    %536 = vector.extract_strided_slice %400 {offsets = [7, 0, 0], sizes = [1, 1, 16], strides = [1, 1, 1]} : vector<8x1x16xf32> to vector<1x1x16xf32>
    %537 = vector.shape_cast %536 : vector<1x1x16xf32> to vector<1x16xf32>
    %c2_176 = arith.constant 2 : index
    %c7_177 = arith.constant 7 : index
    %538 = memref.load %arg3[%c2_176, %c7_177] : memref<4x8xf32, #tpu.memory_space<smem>>
    %539 = vector.broadcast %538 : f32 to vector<1x16xf32>
    %540 = arith.mulf %537, %539 : vector<1x16xf32>
    %541 = arith.addf %535, %540 : vector<1x16xf32>
    %542 = vector.extract_strided_slice %400 {offsets = [0, 0, 0], sizes = [1, 1, 16], strides = [1, 1, 1]} : vector<8x1x16xf32> to vector<1x1x16xf32>
    %543 = vector.shape_cast %542 : vector<1x1x16xf32> to vector<1x16xf32>
    %c3_178 = arith.constant 3 : index
    %c0_179 = arith.constant 0 : index
    %544 = memref.load %arg3[%c3_178, %c0_179] : memref<4x8xf32, #tpu.memory_space<smem>>
    %545 = vector.broadcast %544 : f32 to vector<1x16xf32>
    %546 = arith.mulf %543, %545 : vector<1x16xf32>
    %547 = vector.extract_strided_slice %400 {offsets = [1, 0, 0], sizes = [1, 1, 16], strides = [1, 1, 1]} : vector<8x1x16xf32> to vector<1x1x16xf32>
    %548 = vector.shape_cast %547 : vector<1x1x16xf32> to vector<1x16xf32>
    %c3_180 = arith.constant 3 : index
    %c1_181 = arith.constant 1 : index
    %549 = memref.load %arg3[%c3_180, %c1_181] : memref<4x8xf32, #tpu.memory_space<smem>>
    %550 = vector.broadcast %549 : f32 to vector<1x16xf32>
    %551 = arith.mulf %548, %550 : vector<1x16xf32>
    %552 = arith.addf %546, %551 : vector<1x16xf32>
    %553 = vector.extract_strided_slice %400 {offsets = [2, 0, 0], sizes = [1, 1, 16], strides = [1, 1, 1]} : vector<8x1x16xf32> to vector<1x1x16xf32>
    %554 = vector.shape_cast %553 : vector<1x1x16xf32> to vector<1x16xf32>
    %c3_182 = arith.constant 3 : index
    %c2_183 = arith.constant 2 : index
    %555 = memref.load %arg3[%c3_182, %c2_183] : memref<4x8xf32, #tpu.memory_space<smem>>
    %556 = vector.broadcast %555 : f32 to vector<1x16xf32>
    %557 = arith.mulf %554, %556 : vector<1x16xf32>
    %558 = arith.addf %552, %557 : vector<1x16xf32>
    %559 = vector.extract_strided_slice %400 {offsets = [3, 0, 0], sizes = [1, 1, 16], strides = [1, 1, 1]} : vector<8x1x16xf32> to vector<1x1x16xf32>
    %560 = vector.shape_cast %559 : vector<1x1x16xf32> to vector<1x16xf32>
    %c3_184 = arith.constant 3 : index
    %c3_185 = arith.constant 3 : index
    %561 = memref.load %arg3[%c3_184, %c3_185] : memref<4x8xf32, #tpu.memory_space<smem>>
    %562 = vector.broadcast %561 : f32 to vector<1x16xf32>
    %563 = arith.mulf %560, %562 : vector<1x16xf32>
    %564 = arith.addf %558, %563 : vector<1x16xf32>
    %565 = vector.extract_strided_slice %400 {offsets = [4, 0, 0], sizes = [1, 1, 16], strides = [1, 1, 1]} : vector<8x1x16xf32> to vector<1x1x16xf32>
    %566 = vector.shape_cast %565 : vector<1x1x16xf32> to vector<1x16xf32>
    %c3_186 = arith.constant 3 : index
    %c4_187 = arith.constant 4 : index
    %567 = memref.load %arg3[%c3_186, %c4_187] : memref<4x8xf32, #tpu.memory_space<smem>>
    %568 = vector.broadcast %567 : f32 to vector<1x16xf32>
    %569 = arith.mulf %566, %568 : vector<1x16xf32>
    %570 = arith.addf %564, %569 : vector<1x16xf32>
    %571 = vector.extract_strided_slice %400 {offsets = [5, 0, 0], sizes = [1, 1, 16], strides = [1, 1, 1]} : vector<8x1x16xf32> to vector<1x1x16xf32>
    %572 = vector.shape_cast %571 : vector<1x1x16xf32> to vector<1x16xf32>
    %c3_188 = arith.constant 3 : index
    %c5_189 = arith.constant 5 : index
    %573 = memref.load %arg3[%c3_188, %c5_189] : memref<4x8xf32, #tpu.memory_space<smem>>
    %574 = vector.broadcast %573 : f32 to vector<1x16xf32>
    %575 = arith.mulf %572, %574 : vector<1x16xf32>
    %576 = arith.addf %570, %575 : vector<1x16xf32>
    %577 = vector.extract_strided_slice %400 {offsets = [6, 0, 0], sizes = [1, 1, 16], strides = [1, 1, 1]} : vector<8x1x16xf32> to vector<1x1x16xf32>
    %578 = vector.shape_cast %577 : vector<1x1x16xf32> to vector<1x16xf32>
    %c3_190 = arith.constant 3 : index
    %c6_191 = arith.constant 6 : index
    %579 = memref.load %arg3[%c3_190, %c6_191] : memref<4x8xf32, #tpu.memory_space<smem>>
    %580 = vector.broadcast %579 : f32 to vector<1x16xf32>
    %581 = arith.mulf %578, %580 : vector<1x16xf32>
    %582 = arith.addf %576, %581 : vector<1x16xf32>
    %583 = vector.extract_strided_slice %400 {offsets = [7, 0, 0], sizes = [1, 1, 16], strides = [1, 1, 1]} : vector<8x1x16xf32> to vector<1x1x16xf32>
    %584 = vector.shape_cast %583 : vector<1x1x16xf32> to vector<1x16xf32>
    %c3_192 = arith.constant 3 : index
    %c7_193 = arith.constant 7 : index
    %585 = memref.load %arg3[%c3_192, %c7_193] : memref<4x8xf32, #tpu.memory_space<smem>>
    %586 = vector.broadcast %585 : f32 to vector<1x16xf32>
    %587 = arith.mulf %584, %586 : vector<1x16xf32>
    %588 = arith.addf %582, %587 : vector<1x16xf32>
    %589 = vector.shape_cast %447 : vector<1x16xf32> to vector<1x1x16xf32>
    %590 = vector.shape_cast %494 : vector<1x16xf32> to vector<1x1x16xf32>
    %591 = vector.shape_cast %541 : vector<1x16xf32> to vector<1x1x16xf32>
    %592 = vector.shape_cast %588 : vector<1x16xf32> to vector<1x1x16xf32>
    %593 = tpu.concatenate %589, %590, %591, %592 in 0 : vector<1x1x16xf32>, vector<1x1x16xf32>, vector<1x1x16xf32>, vector<1x1x16xf32> -> vector<4x1x16xf32>
    %594 = vector.shape_cast %201 : vector<4x16x16xf32> to vector<64x16xf32>
    %595 = vector.shape_cast %397 : vector<4x1x16xf32> to vector<4x16xf32>
    %596 = vector.shape_cast %593 : vector<4x1x16xf32> to vector<4x16xf32>
    %597 = tpu.concatenate %594, %595, %596 in 0 : vector<64x16xf32>, vector<4x16xf32>, vector<4x16xf32> -> vector<72x16xf32>
    %598 = arith.truncf %597 : vector<72x16xf32> to vector<72x16xbf16>
    %c0_194 = arith.constant 0 : index
    %c0_195 = arith.constant 0 : index
    %599 = vector.load %arg4[%c0_194, %c0_195] : memref<16x32xbf16, #tpu.memory_space<vmem>>, vector<16x32xbf16>
    %cst = arith.constant dense<0.000000e+00> : vector<72x32xf32>
    %600 = tpu.matmul %598, %599, %cst {dimension_numbers = #tpu.dot_dimension_numbers<[1], [0], [0], [1], [0, 0, 1, 1], [], []>} : vector<72x16xbf16>, vector<16x32xbf16>, vector<72x32xf32> -> vector<72x32xf32>
    %601 = vector.extract_strided_slice %600 {offsets = [0, 0], sizes = [64, 32], strides = [1, 1]} : vector<72x32xf32> to vector<64x32xf32>
    %602 = vector.extract_strided_slice %600 {offsets = [64, 0], sizes = [4, 32], strides = [1, 1]} : vector<72x32xf32> to vector<4x32xf32>
    %603 = vector.shape_cast %602 : vector<4x32xf32> to vector<4x1x32xf32>
    %604 = vector.extract_strided_slice %600 {offsets = [68, 0], sizes = [4, 32], strides = [1, 1]} : vector<72x32xf32> to vector<4x32xf32>
    %605 = vector.shape_cast %604 : vector<4x32xf32> to vector<4x1x32xf32>
    %c1_i32_196 = arith.constant 1 : i32
    %606 = tpu.dynamic_rotate %601 by %c1_i32_196 dim 0 : vector<64x32xf32>, i32 -> vector<64x32xf32>
    %607 = vector.shape_cast %606 : vector<64x32xf32> to vector<4x16x32xf32>
    %c63_i32 = arith.constant 63 : i32
    %608 = tpu.dynamic_rotate %601 by %c63_i32 dim 0 : vector<64x32xf32>, i32 -> vector<64x32xf32>
    %609 = vector.shape_cast %608 : vector<64x32xf32> to vector<4x16x32xf32>
    %610 = vector.shape_cast %601 : vector<64x32xf32> to vector<4x16x32xf32>
    %611 = tpu.iota {dimensions = array<i32: 1>} : vector<4x16x32xi32>
    %c0_i32_197 = arith.constant 0 : i32
    %612 = vector.broadcast %c0_i32_197 : i32 to vector<4x16x32xi32>
    %613 = arith.cmpi eq, %611, %612 : vector<4x16x32xi32>
    %614 = vector.shape_cast %603 : vector<4x1x32xf32> to vector<4x1x32xf32>
    %615 = vector.broadcast %614 : vector<4x1x32xf32> to vector<4x16x32xf32>
    %616 = arith.select %613, %615, %607 : vector<4x16x32xi1>, vector<4x16x32xf32>
    %c15_i32_198 = arith.constant 15 : i32
    %617 = vector.broadcast %c15_i32_198 : i32 to vector<4x16x32xi32>
    %618 = arith.cmpi eq, %611, %617 : vector<4x16x32xi32>
    %619 = vector.shape_cast %605 : vector<4x1x32xf32> to vector<4x1x32xf32>
    %620 = vector.broadcast %619 : vector<4x1x32xf32> to vector<4x16x32xf32>
    %621 = arith.select %618, %620, %609 : vector<4x16x32xi1>, vector<4x16x32xf32>
    %cst_199 = arith.constant 7.500000e-01 : f32
    %622 = vector.broadcast %cst_199 : f32 to vector<4x16x32xf32>
    %623 = arith.mulf %622, %610 : vector<4x16x32xf32>
    %cst_200 = arith.constant 2.500000e-01 : f32
    %624 = vector.broadcast %cst_200 : f32 to vector<4x16x32xf32>
    %625 = arith.mulf %624, %616 : vector<4x16x32xf32>
    %626 = arith.addf %623, %625 : vector<4x16x32xf32>
    %cst_201 = arith.constant 7.500000e-01 : f32
    %627 = vector.broadcast %cst_201 : f32 to vector<4x16x32xf32>
    %628 = arith.mulf %627, %610 : vector<4x16x32xf32>
    %cst_202 = arith.constant 2.500000e-01 : f32
    %629 = vector.broadcast %cst_202 : f32 to vector<4x16x32xf32>
    %630 = arith.mulf %629, %621 : vector<4x16x32xf32>
    %631 = arith.addf %628, %630 : vector<4x16x32xf32>
    %c0_203 = arith.constant 0 : index
    %c0_204 = arith.constant 0 : index
    %c0_205 = arith.constant 0 : index
    %c0_206 = arith.constant 0 : index
    %632 = vector.load %arg5[%c0_203, %c0_204, %c0_205, %c0_206] : memref<1x4x16x64xf32, #tpu.memory_space<vmem>>, vector<1x4x16x64xf32>
    %633 = vector.shape_cast %632 : vector<1x4x16x64xf32> to vector<4x16x64xf32>
    %634 = vector.extract_strided_slice %633 {offsets = [0, 0, 0], sizes = [4, 16, 32], strides = [1, 1, 1]} : vector<4x16x64xf32> to vector<4x16x32xf32>
    %635 = arith.addf %626, %634 : vector<4x16x32xf32>
    %c0_207 = arith.constant 0 : index
    %c0_208 = arith.constant 0 : index
    %c0_209 = arith.constant 0 : index
    %c0_210 = arith.constant 0 : index
    %636 = vector.load %arg6[%c0_207, %c0_208, %c0_209, %c0_210] : memref<1x4x16x64xf32, #tpu.memory_space<vmem>>, vector<1x4x16x32xf32>
    %637 = vector.shape_cast %636 : vector<1x4x16x32xf32> to vector<4x16x32xf32>
    %638 = vector.shape_cast %635 : vector<4x16x32xf32> to vector<1x4x16x32xf32>
    tpu.vector_store %arg6[%c0_207, %c0_208, %c0_209, %c0_210], %638 {strides = array<i32>} : memref<1x4x16x64xf32, #tpu.memory_space<vmem>>, vector<1x4x16x32xf32>,
    %639 = vector.extract_strided_slice %633 {offsets = [0, 0, 32], sizes = [4, 16, 32], strides = [1, 1, 1]} : vector<4x16x64xf32> to vector<4x16x32xf32>
    %640 = arith.addf %631, %639 : vector<4x16x32xf32>
    %c0_211 = arith.constant 0 : index
    %c0_212 = arith.constant 0 : index
    %c0_213 = arith.constant 0 : index
    %c32 = arith.constant 32 : index
    %641 = vector.load %arg6[%c0_211, %c0_212, %c0_213, %c32] : memref<1x4x16x64xf32, #tpu.memory_space<vmem>>, vector<1x4x16x32xf32>
    %642 = vector.shape_cast %641 : vector<1x4x16x32xf32> to vector<4x16x32xf32>
    %643 = vector.shape_cast %640 : vector<4x16x32xf32> to vector<1x4x16x32xf32>
    tpu.vector_store %arg6[%c0_211, %c0_212, %c0_213, %c32], %643 {strides = array<i32>} : memref<1x4x16x64xf32, #tpu.memory_space<vmem>>, vector<1x4x16x32xf32>,
    return
  }
  func.func @transform_0(%arg0: i32, %arg1: i32) -> (i32, i32, i32, i32) {
    %c0_i32 = arith.constant 0 : i32
    %c0_i32_0 = arith.constant 0 : i32
    %c0_i32_1 = arith.constant 0 : i32
    %c0_i32_2 = arith.constant 0 : i32
    return %arg0, %c0_i32, %c0_i32_0, %c0_i32_1 : i32, i32, i32, i32
  }
  func.func @transform_1(%arg0: i32, %arg1: i32) -> (i32, i32) {
    %c0_i32 = arith.constant 0 : i32
    %c0_i32_0 = arith.constant 0 : i32
    %c0_i32_1 = arith.constant 0 : i32
    return %c0_i32, %c0_i32_0 : i32, i32
  }
  func.func @transform_2(%arg0: i32, %arg1: i32) -> (i32, i32) {
    %c0_i32 = arith.constant 0 : i32
    %c0_i32_0 = arith.constant 0 : i32
    %c0_i32_1 = arith.constant 0 : i32
    return %c0_i32, %c0_i32_0 : i32, i32
  }
  func.func @transform_3(%arg0: i32, %arg1: i32) -> (i32, i32, i32, i32) {
    %c0_i32 = arith.constant 0 : i32
    %c0_i32_0 = arith.constant 0 : i32
    %c0_i32_1 = arith.constant 0 : i32
    return %arg0, %c0_i32, %arg1, %c0_i32_0 : i32, i32, i32, i32
  }
  func.func @transform_4(%arg0: i32, %arg1: i32) -> (i32, i32, i32, i32) {
    %c0_i32 = arith.constant 0 : i32
    %c0_i32_0 = arith.constant 0 : i32
    %c0_i32_1 = arith.constant 0 : i32
    return %arg0, %c0_i32, %arg1, %c0_i32_0 : i32, i32, i32, i32
  }
}

</mosaic_0001>

<bundles_post_ra>
// kernel: skip_upsample.1
= control target key start
LH: loop header
LB: loop body
LE: loop exit
PB: predicated region body
PF: predicated region fallthrough
CT: control target
= control target key end

     0   :  { %9 = vsyncpa [#allocation3], 0  ;;  %s1366_s15 = smov 0   ;;  %s1368_s16 = smov 0   ;;  %s2204_s0 = inlined_call_operand.vmem [shape: f32[2,8,16,16], index: 0, kind: input, shape index: {}]   ;;  %s2205_s1 = inlined_call_operand.vmem [shape: f32[4,8], index: 1, kind: input, shape index: {}]   ;;  %s2206_s2 = inlined_call_operand.vmem [shape: bf16[16,32], index: 2, kind: input, shape index: {}]   ;;  %s2207_s3 = inlined_call_operand.vmem [shape: f32[2,4,16,64], index: 3, kind: input, shape index: {}]   ;;  %s2208_s4 = inlined_call_operand.vmem [shape: f32[2,4,16,64], index: 4, kind: output, shape index: {}]  }
   0x1   :  { %s1370_s17 = smov 0  }
   0x2 LB: > { %s1158_s18 = sadd.s32 4294967295, %s1333_s17   ;;  %s27_s19 = sadd.s32 1, %s1329_s16  ;;  %s1333_s17 = sphi %s1370_s17, %s15_s17   ;;  %s1329_s16 = sphi %s1368_s16, %s2321_s16   ;;  %s1325_s15 = sphi %s1366_s15, %s2320_s15  }
   0x3   : > { %p29_p0 = scmp.ge.s32.totalorder %s27_s19, 2  ;;  %p1160_p1 = scmp.ge.s32.totalorder %s1333_s17, 1 }
   0x4   : > { %p156_p2 = scmp.lt.s32.totalorder %s1333_s17, 3  ;;  %p1391_p4 = scmp.eq.s32.totalorder %s1158_s18, 0 }
   0x5   : > { %s2323_s19 = smov (%p29_p0, %s27_s19), 0  ;;  %s169_s24 = sshll.u32 %s2205_s1, 4  ;;  %s170_s24 = int_to_ptr.vmem [resolvable:$true] %s169_s24 }
   0x6   : > { %p1387_p3 = pnand %p1160_p1, %p156_p2  ;;  %s1292_s25 = scalar_lea.vmem %s170_s24, 64 }
   0x7   : > { %p1293_p7 = scmp.ne.s32.totalorder %s170_s24, %s1292_s25  ;;  %p1300_p11 = scmp.lt.s32.totalorder %s170_s24, %s170_s24 }
   0x8   : > { %p1255_p5 = pneg %p1387_p3  ;;  %p1301_p12 = scmp.lt.s32.totalorder %s1292_s25, %s1292_s25 }
   0xa   : > { %p1256_p6 = pnand %p1391_p4, %p1255_p5  ;;  %p1302_p13 = por %p1301_p12, %p1300_p11 }
   0xc   : > { %p1294_p8 = pneg %p1256_p6 }
   0xe   : > { %p1295_p9 = pnand %p1294_p8, %p1293_p7 }
  0x10   : > { %p1296_p10 = pneg %p1295_p9 }
  0x12   : > { %p1303_p0 = pnand %p1302_p13, %p1296_p10 }
  0x14   : > { %1306 = shalt.err (!%p1303_p0)
}
  0x15   : > { %s1335_s26 = smov [#allocation2]   ;;  %206 = sbr.rel (%p1387_p3) target bundleno = 476 (0x1dc), region = 36 }
  0x16   : > { %1258 = dma.vmem_to_smem (!%p1256_p6), %s170_s24, 64, %s1335_s26, [#allocation3]  }
  0x1c   : > { %1320 = dma.done.wait (%p1391_p4), [#allocation3], 64  }
  0x1d   : > { %1322 = vsyncadd (%p1391_p4), [#allocation3], 4294967232 }
  0x1e   : > { %212 = sfence }
  0x1f   : > { %v1291_v0 = vld [vmem:[%s2206_s2] sm:$0xff]   ;;  %v2209_v1 = vmov 0.0   ;;  %p246_p1 = scmp.lt.s32.totalorder %s1325_s15, 1  ;;  %s296_s29 = sld [smem:[#allocation2]]  ;;  %vm1337_vm0 = vmmov 0   ;;  %vm662_vm1 = vcmask 130048  }
  0x20   : > { %1227 = vmatprep.subr.bf16.mxu0 %v2209_v1  ;;  %1249 = vmatprep.subr.bf16.mxu1 %v2209_v1  ;;  %s1171_s30 = sld [smem:[#allocation2 + $0x1]]  ;;  %s1172_s5 = sld [smem:[#allocation2 + $0x2]]  ;;  %vm623_vm2 = vcmask 1041409   ;;  %vm638_vm3 = vcmask 1045509   ;;  %vm626_vm4 = vcmask 1042434   ;;  %vm641_vm5 = vcmask 1046534  }
  0x21   : > { %1228 = vmatpush3.bf16.msra.mxu0 %v1291_v0  ;;  %1250 = vmatpush3.bf16.msra.mxu1 %v1291_v0  ;;  %s2325_s15 = smov (!%p246_p1, %s1325_s15), 1  ;;  %s1173_s6 = sld [smem:[#allocation2 + $0x3]]  ;;  %vm629_vm6 = vcmask 1043459   ;;  %vm644_vm7 = vcmask 1047559   ;;  %vm647_vm8 = vcmask 1043456   ;;  %vm953_vm11 = vcmask 261120  }
  0x22   : > { %1229 = vmatprep.mubr.msk.bf16.mxu0 %vm1337_vm0, %v2209_v1  ;;  %1241 = vmatprep.mubr.msk.bf16.mxu1 %vm1337_vm0, %v2209_v1  ;;  %s1421_s7 = sld [smem:[#allocation2 + $0x4]]  ;;  %s1218_s8 = sshll.u32 %s2325_s15, 7  ;;  %vm1034_vm14 = vcmask 523520  }
  0x23   : > { %s1424_s9 = sld [smem:[#allocation2 + $0x5]]  ;;  %s1429_s12 = scalar_lea.vmem %s2204_s0, %s1218_s8 }
  0x24   : > { %s1431_s13 = sld [smem:[#allocation2 + $0x6]]  ;;  %v1434_v2 = vld [vmem:[%s1429_s12] sm:$0xff]  ;;  %v1437_v3 = vld [vmem:[%s1429_s12 + $0x8] sm:$0xff]  ;;  %v1440_v4 = vld [vmem:[%s1429_s12 + $0x10] sm:$0xff]  ;;  %s1444_s14 = sld [smem:[#allocation2 + $0x7]] }
  0x25   : > { %2245 = vst [vmem:[#allocation5_spill] sm:$0xff] %v1434_v2  ;;  %2246 = vst [vmem:[#allocation6_spill] sm:$0xff] %v1437_v3  ;;  %v1442_v5 = vstv %s296_s29  ;;  %v1447_v6 = vld [vmem:[%s1429_s12 + $0x18] sm:$0xff]  ;;  %v1450_v7 = vld [vmem:[%s1429_s12 + $0x20] sm:$0xff]  ;;  %s1504_s18 = sld [smem:[#allocation2 + $0x180]]  ;;  %s1219_s20 = sshll.u32 %s2325_s15, 6 }
  0x26   : > { %2247 = vst [vmem:[#allocation7_spill] sm:$0xff] %v1440_v4  ;;  %2248 = vst [vmem:[#allocation8_spill] sm:$0xff] %v1447_v6  ;;  %v1453_v8 = vld [vmem:[%s1429_s12 + $0x28] sm:$0xff]  ;;  %v298_v9 = vmul.f32 %v1442_v5, %v1434_v2  ;;  %v299_v10 = vmul.f32 %v1442_v5, %v1437_v3  ;;  %v1459_v11 = vstv %s1171_s30  ;;  %v1462_v12 = vld [vmem:[%s1429_s12 + $0x30] sm:$0xff]  ;;  %v1471_v16 = vstv %s1172_s5  ;;  %s1517_s21 = sld [smem:[#allocation2 + $0x181]]  ;;  %s1519_s22 = sld [smem:[#allocation2 + $0x182]] }
  0x27   : > { %2249 = vst [vmem:[#allocation9_spill] sm:$0xff] %v1450_v7  ;;  %2250 = vst [vmem:[#allocation10_spill] sm:$0xff] %v1453_v8  ;;  %v1465_v13 = vld [vmem:[%s1429_s12 + $0x38] sm:$0xff]  ;;  %v302_v14 = vmul.f32 %v1459_v11, %v1440_v4  ;;  %v303_v15 = vmul.f32 %v1459_v11, %v1447_v6  ;;  %v1474_v17 = vld [vmem:[%s1429_s12 + $0x40] sm:$0xff]  ;;  %v308_v19 = vmul.f32 %v1471_v16, %v1450_v7  ;;  %v1483_v21 = vstv %s1173_s6  ;;  %s1526_s23 = sld [smem:[#allocation2 + $0x183]]  ;;  %s1536_s24 = sld [smem:[#allocation2 + $0x184]] }
  0x28   : > { %2251 = vst [vmem:[#allocation11_spill] sm:$0xff] %v1462_v12  ;;  %2252 = vst [vmem:[#allocation12_spill] sm:$0xff] %v1465_v13  ;;  %v1477_v18 = vld [vmem:[%s1429_s12 + $0x48] sm:$0xff]  ;;  %v309_v20 = vmul.f32 %v1471_v16, %v1453_v8  ;;  %v1486_v22 = vld [vmem:[%s1429_s12 + $0x50] sm:$0xff]  ;;  %v314_v25 = vmul.f32 %v1483_v21, %v1462_v12  ;;  %v315_v26 = vmul.f32 %v1483_v21, %v1465_v13  ;;  %v1496_v28 = vstv %s1421_s7  ;;  %s1538_s25 = sld [smem:[#allocation2 + $0x185]]  ;;  %s1558_s28 = scalar_lea.vmem %s2207_s3, %s1219_s20 }
  0x29   : > { %2253 = vst [vmem:[#allocation13_spill] sm:$0xff] %v1474_v17  ;;  %2254 = vst [vmem:[#allocation14_spill] sm:$0xff] %v1477_v18  ;;  %v304_v23 = vadd.f32 %v302_v14, %v298_v9  ;;  %v305_v24 = vadd.f32 %v303_v15, %v299_v10  ;;  %v1493_v27 = vld [vmem:[%s1429_s12 + $0x58] sm:$0xff]  ;;  %v1499_v29 = vstv %s1424_s9  ;;  %v1508_v31 = vld [vmem:[%s1429_s12 + $0x60] sm:$0xff]  ;;  %v320_v35 = vmul.f32 %v1496_v28, %v1474_v17  ;;  %s1631_s29 = sld [smem:[#allocation2 + $0x186]]  ;;  %s1633_s30 = sld [smem:[#allocation2 + $0x187]] }
  0x2a   : > { %2255 = vst [vmem:[#allocation15_spill] sm:$0xff] %v1486_v22  ;;  %2256 = vst [vmem:[#allocation16_spill] sm:$0xff] %v1493_v27  ;;  %v1502_v30 = vstv %s1431_s13  ;;  %v1511_v32 = vld [vmem:[%s1429_s12 + $0x68] sm:$0xff]  ;;  %v321_v36 = vmul.f32 %v1496_v28, %v1477_v18  ;;  %v1522_v37 = vld [vmem:[%s1429_s12 + $0x70] sm:$0xff]  ;;  %v326_v38 = vmul.f32 %v1499_v29, %v1486_v22  ;;  %v327_v42 = vmul.f32 %v1499_v29, %v1493_v27  ;;  %s1338_s5 = smov 96   ;;  %s1644_s6 = sld [smem:[#allocation2 + $0x80]] }
  0x2b   : > { %2257 = vst [vmem:[#allocation17_spill] sm:$0xff] %v1508_v31  ;;  %2258 = vst [vmem:[#allocation18_spill] sm:$0xff] %v1511_v32  ;;  %v310_v33 = vadd.f32 %v308_v19, %v304_v23  ;;  %v311_v34 = vadd.f32 %v309_v20, %v305_v24  ;;  %v1529_v39 = vld [vmem:[%s1429_s12 + $0x78] sm:$0xff]  ;;  %v1534_v43 = vstv %s1444_s14  ;;  %v332_v44 = vmul.f32 %v1502_v30, %v1508_v31  ;;  %v1545_v46 = vld [vmem:[%s1429_s12] sm:$0x1]  ;;  %s1646_s7 = sld [smem:[#allocation2 + $0x81]] }
  0x2c   : > { %2259 = vst [vmem:[#allocation19_spill] sm:$0xff] %v1522_v37  ;;  %2260 = vst [vmem:[#allocation20_spill] sm:$0xff] %v1529_v39  ;;  %v333_v45 = vmul.f32 %v1502_v30, %v1511_v32  ;;  %v1548_v47 = vld [vmem:[%s1429_s12 + $0x10] sm:$0x1]  ;;  %v1551_v48 = vld [vmem:[%s1429_s12 + $0x20] sm:$0x1]  ;;  %v338_v51 = vmul.f32 %v1534_v43, %v1522_v37  ;;  %v1567_v53 = vmul.f32 %v1545_v46, %v1442_v5 }
  0x2d   : > { %v316_v40 = vadd.f32 %v314_v25, %v310_v33  ;;  %v317_v41 = vadd.f32 %v315_v26, %v311_v34  ;;  %v1563_v52 = vld [vmem:[%s1429_s12 + $0x30] sm:$0x1]  ;;  %v1570_v54 = vld [vmem:[%s1429_s12 + $0xf] sm:$0x1]  ;;  %v1573_v55 = vld [vmem:[%s1429_s12 + $0x1f] sm:$0x1]  ;;  %v339_v56 = vmul.f32 %v1534_v43, %v1529_v39  ;;  %v1585_v59 = vmul.f32 %v1548_v47, %v1459_v11 }
  0x2e   : > { %v1578_v57 = vld [vmem:[%s1429_s12 + $0x40] sm:$0x1]  ;;  %v1581_v58 = vld [vmem:[%s1429_s12 + $0x50] sm:$0x1]  ;;  %v1589_v60 = vmul.f32 %v1551_v48, %v1471_v16  ;;  %v1593_v61 = vmul.f32 %v1563_v52, %v1483_v21  ;;  %v1596_v62 = vld [vmem:[%s1429_s12 + $0x2f] sm:$0x1]  ;;  %v1625_v24 = vmul.f32 %v1570_v54, %v1442_v5  ;;  %v1629_v25 = vmul.f32 %v1573_v55, %v1459_v11 }
  0x2f   : > { %v322_v49 = vadd.f32 %v320_v35, %v316_v40  ;;  %v323_v50 = vadd.f32 %v321_v36, %v317_v41  ;;  %v1599_v9 = vld [vmem:[%s1429_s12 + $0x60] sm:$0x1]  ;;  %v1602_v10 = vld [vmem:[%s1429_s12 + $0x70] sm:$0x1]  ;;  %v1606_v14 = vmul.f32 %v1578_v57, %v1496_v28  ;;  %v1610_v15 = vmul.f32 %v1581_v58, %v1499_v29  ;;  %v1649_v11 = vld [vmem:[%s1558_s28 + $0x8] sm:$0xff]  ;;  %s1689_s8 = sld [smem:[#allocation2 + $0x82]] }
  0x30   : > { %v1613_v19 = vld [vmem:[%s1558_s28] sm:$0xff]  ;;  %v1617_v20 = vmul.f32 %v1599_v9, %v1502_v30  ;;  %v1621_v23 = vmul.f32 %v1602_v10, %v1534_v43  ;;  %2266 = vst [vmem:[#allocation26_spill] sm:$0xff] %v1625_v24  ;;  %2267 = vst [vmem:[#allocation27_spill] sm:$0xff] %v1629_v25  ;;  %v1639_v5 = vmul.f32 %v1596_v62, %v1471_v16  ;;  %v1642_v34 = vstv %s1504_s18  ;;  %v1652_v35 = vld [vmem:[%s1558_s28 + $0x10] sm:$0xff]  ;;  %s1691_s9 = sld [smem:[#allocation2 + $0x83]]  ;;  %s1720_s10 = sld [smem:[#allocation2 + $0x84]] }
  0x31   : > { %v328_v63 = vadd.f32 %v326_v38, %v322_v49  ;;  %v329_v0 = vadd.f32 %v327_v42, %v323_v50  ;;  %2261 = vst [vmem:[#allocation21_spill] sm:$0xff] %v1606_v14  ;;  %2262 = vst [vmem:[#allocation22_spill] sm:$0xff] %v1610_v15  ;;  %970 = vrot.lane.b32.xlu0 %v1613_v19, %s1338_s5  ;;  %v436_v36 = vmul.f32 %v1642_v34, %v1434_v2  ;;  %s1743_s11 = sld [smem:[#allocation2 + $0x85]]  ;;  %s1764_s13 = sld [smem:[#allocation2 + $0x86]]  ;;  %v1787_v24 = vld [vmem:[%s1429_s12 + $0x6f] sm:$0x1] }
  0x32   : > { %2263 = vst [vmem:[#allocation23_spill] sm:$0xff] %v1613_v19  ;;  %2264 = vst [vmem:[#allocation24_spill] sm:$0xff] %v1617_v20  ;;  %v437_v16 = vmul.f32 %v1642_v34, %v1437_v3  ;;  %v1659_v38 = vstv %s1517_s21  ;;  %v1662_v40 = vstv %s1519_s22  ;;  %974 = vrot.lane.b32.xlu1 %v1652_v35, %s1338_s5  ;;  %s1766_s14 = sld [smem:[#allocation2 + $0x87]]  ;;  %s1814_s18 = sld [smem:[#allocation2 + $0x100]] }
  0x33   : > { %2265 = vst [vmem:[#allocation25_spill] sm:$0xff] %v1621_v23  ;;  %v334_v26 = vadd.f32 %v332_v44, %v328_v63  ;;  %v335_v33 = vadd.f32 %v333_v45, %v329_v0  ;;  %2268 = vst [vmem:[#allocation28_spill] sm:$0xff] %v1639_v5  ;;  %v1667_v44 = vld [vmem:[%s1429_s12 + $0x3f] sm:$0x1]  ;;  %v1670_v45 = vld [vmem:[%s1429_s12 + $0x4f] sm:$0x1]  ;;  %v440_v49 = vmul.f32 %v1659_v38, %v1440_v4 }
  0x34   : > { %2269 = vst [vmem:[#allocation29_spill] sm:$0xff] %v1649_v11  ;;  %2270 = vst [vmem:[#allocation30_spill] sm:$0xff] %v1652_v35  ;;  %v441_v50 = vmul.f32 %v1659_v38, %v1447_v6  ;;  %v1677_v63 = vld [vmem:[%s1558_s28 + $0x18] sm:$0xff]  ;;  %v446_v0 = vmul.f32 %v1662_v40, %v1450_v7  ;;  %v1699_v23 = vmul.f32 %v1667_v44, %v1483_v21  ;;  %s1816_s21 = sld [smem:[#allocation2 + $0x101]]  ;;  %s1828_s22 = sld [smem:[#allocation2 + $0x103]] }
  0x35   : > { %v340_v41 = vadd.f32 %v338_v51, %v334_v26  ;;  %v341_v42 = vadd.f32 %v339_v56, %v335_v33  ;;  %2271 = vst [vmem:[#allocation31_spill] sm:$0xff] %v1677_v63  ;;  %v447_v51 = vmul.f32 %v1662_v40, %v1453_v8  ;;  %v1684_v56 = vstv %s1526_s23  ;;  %972 = vrot.lane.b32.xlu0 %v1649_v11, %s1338_s5  ;;  %s1839_s23 = sld [smem:[#allocation2 + $0x104]]  ;;  %s1873_s26 = sld [smem:[#allocation2 + $0x107]] }
  0x36   : > { %v1687_v26 = vstv %s1536_s24  ;;  %v442_v1 = vadd.f32 %v440_v49, %v436_v36  ;;  %v443_v35 = vadd.f32 %v441_v50, %v437_v16  ;;  %v452_v19 = vmul.f32 %v1684_v56, %v1462_v12  ;;  %2273 = vst [vmem:[#allocation33_spill] sm:$0xff] %v1699_v23  ;;  %v1711_v36 = vld [vmem:[%s1558_s28 + $0x20] sm:$0xff]  ;;  %976 = vrot.lane.b32.xlu1 %v1677_v63, %s1338_s5  ;;  %v1723_v49 = vld [vmem:[%s1558_s28 + $0x28] sm:$0xff]  ;;  %s1847_s24 = sld [smem:[#allocation2 + $0x105]] }
  0x37   : > { %2272 = vst [vmem:[#allocation32_spill] sm:$0xff] %v1687_v26  ;;  %v649_v33 = vpack.c.bf16 %v341_v42, %v340_v41  ;;  %v1703_v20 = vmul.f32 %v1670_v45, %v1496_v28  ;;  %v453_v11 = vmul.f32 %v1684_v56, %v1465_v13  ;;  %v1708_v41 = vstv %s1538_s25  ;;  %2276 = vst [vmem:[#allocation36_spill] sm:$0xff] %v1711_v36  ;;  %s1857_s25 = sld [smem:[#allocation2 + $0x106]] }
  0x38   : > { %2275 = vst [vmem:[#allocation35_spill] sm:$0xff] %v1708_v41  ;;  %v448_v21 = vadd.f32 %v446_v0, %v442_v1  ;;  %v449_v16 = vadd.f32 %v447_v51, %v443_v35  ;;  %v458_v28 = vmul.f32 %v1687_v26, %v1474_v17  ;;  %v459_v42 = vmul.f32 %v1687_v26, %v1477_v18 }
  0x39   : > { %2274 = vst [vmem:[#allocation34_spill] sm:$0xff] %v1703_v20  ;;  %1230 = vmatmul.mubr.msk.bf16.vlgmr.msra.gmra.mrb[0].mxu0 %vm662_vm1, %v649_v33  ;;  %2277 = vst [vmem:[#allocation37_spill] sm:$0xff] %v1723_v49  ;;  %v464_v50 = vmul.f32 %v1708_v41, %v1486_v22  ;;  %v465_v63 = vmul.f32 %v1708_v41, %v1493_v27  ;;  %v1730_v33 = vstv %s1631_s29  ;;  %v1733_v1 = vstv %s1633_s30  ;;  %s2048_s29 = scalar_lea.vmem %s2208_s4, %s1219_s20  ;;  %s1339_s30 = smov 32  }
  0x3a   : > { %2278 = vst [vmem:[#allocation38_spill] sm:$0xff] %v1730_v33  ;;  %2279 = vst [vmem:[#allocation39_spill] sm:$0xff] %v1733_v1  ;;  %v2280_v35 = vmov 0.0   ;;  %v454_v0 = vadd.f32 %v452_v19, %v448_v21  ;;  %v455_v51 = vadd.f32 %v453_v11, %v449_v16  ;;  %v1738_v20 = vstv %s1644_s6  ;;  %978 = vrot.lane.b32.xlu0 %v1711_v36, %s1338_s5  ;;  %v1756_v21 = vld [vmem:[%s1558_s28 + $0x30] sm:$0xff]  ;;  %980 = vrot.lane.b32.xlu1 %v1723_v49, %s1338_s5 }
  0x3b   : > { %1233 = vmatprep.mubr.msk.bf16.mxu0 %vm1337_vm0, %v2280_v35  ;;  %v1741_v23 = vstv %s1646_s7  ;;  %v470_v15 = vmul.f32 %v1730_v33, %v1508_v31  ;;  %v471_v5 = vmul.f32 %v1730_v33, %v1511_v32  ;;  %v344_v19 = vmul.f32 %v1738_v20, %v1434_v2  ;;  %2281 = vst [vmem:[#allocation40_spill] sm:$0xff] %v1756_v21  ;;  %v1769_v2 = vld [vmem:[%s1558_s28 + $0x38] sm:$0xff] }
  0x3c   : > { %v345_v11 = vmul.f32 %v1738_v20, %v1437_v3  ;;  %v460_v16 = vadd.f32 %v458_v28, %v454_v0  ;;  %v461_v36 = vadd.f32 %v459_v42, %v455_v51  ;;  %v348_v41 = vmul.f32 %v1741_v23, %v1440_v4  ;;  %2282 = vst [vmem:[#allocation41_spill] sm:$0xff] %v1769_v2  ;;  %v1772_v3 = vld [vmem:[%s1429_s12 + $0x5f] sm:$0x1] }
  0x3d   : > { %v349_v33 = vmul.f32 %v1741_v23, %v1447_v6  ;;  %v476_v49 = vmul.f32 %v1733_v1, %v1522_v37  ;;  %v477_v28 = vmul.f32 %v1733_v1, %v1529_v39  ;;  %v1779_v42 = vstv %s1689_s8 }
  0x3e   : > { %v1782_v0 = vstv %s1691_s9  ;;  %v466_v51 = vadd.f32 %v464_v50, %v460_v16  ;;  %v467_v6 = vadd.f32 %v465_v63, %v461_v36  ;;  %v350_v4 = vadd.f32 %v348_v41, %v344_v19  ;;  %982 = vrot.lane.b32.xlu0 %v1756_v21, %s1338_s5  ;;  %984 = vrot.lane.b32.xlu1 %v1769_v2, %s1338_s5  ;;  %v1805_v19 = vld [vmem:[%s1429_s12 + $0x7f] sm:$0x1]  ;;  %s1820_s12 = sld [smem:[#allocation2 + $0x102]] }
  0x3f   : > { %v351_v25 = vadd.f32 %v349_v33, %v345_v11  ;;  %v354_v26 = vmul.f32 %v1779_v42, %v1450_v7  ;;  %v355_v1 = vmul.f32 %v1779_v42, %v1453_v8  ;;  %v360_v14 = vmul.f32 %v1782_v0, %v1462_v12 }
  0x40   : > { %v361_v63 = vmul.f32 %v1782_v0, %v1465_v13  ;;  %v1801_v41 = vmul.f32 %v1772_v3, %v1499_v29  ;;  %v472_v36 = vadd.f32 %v470_v15, %v466_v51  ;;  %v473_v50 = vadd.f32 %v471_v5, %v467_v6 }
  0x41   : > { %v365_v33 = vstv %s1720_s10  ;;  %v356_v11 = vadd.f32 %v354_v26, %v350_v4  ;;  %v357_v16 = vadd.f32 %v355_v1, %v351_v25  ;;  %v1811_v2 = vmul.f32 %v1787_v24, %v1502_v30 }
  0x42   : > { %v366_v21 = vmul.f32 %v365_v33, %v1474_v17  ;;  %v367_v13 = vmul.f32 %v365_v33, %v1477_v18  ;;  %v478_v12 = vadd.f32 %v476_v49, %v472_v36  ;;  %v479_v29 = vadd.f32 %v477_v28, %v473_v50 }
  0x43   : > { %v371_v8 = vstv %s1743_s11  ;;  %v362_v6 = vadd.f32 %v360_v14, %v356_v11  ;;  %v363_v4 = vadd.f32 %v361_v63, %v357_v16  ;;  %v1824_v5 = vmul.f32 %v1805_v19, %v1534_v43 }
  0x44   : > { %v372_v15 = vmul.f32 %v371_v8, %v1486_v22  ;;  %v373_v25 = vmul.f32 %v371_v8, %v1493_v27  ;;  %v652_v30 = vpack.c.bf16 %v479_v29, %v478_v12  ;;  %v377_v26 = vstv %s1764_s13  ;;  %v2285_v27 = vld [vmem:[#allocation26_spill] sm:$0xff]  ;;  %v2286_v22 = vld [vmem:[#allocation27_spill] sm:$0xff] }
  0x45   : > { %v383_v49 = vstv %s1766_s14  ;;  %v368_v1 = vadd.f32 %v366_v21, %v362_v6  ;;  %v369_v28 = vadd.f32 %v367_v13, %v363_v4  ;;  %v378_v14 = vmul.f32 %v377_v26, %v1508_v31 }
  0x46   : > { %v379_v51 = vmul.f32 %v377_v26, %v1511_v32  ;;  %1242 = vmatmul.mubr.msk.bf16.vlgmr.msra.gmra.mrb[0].mxu1 %vm662_vm1, %v652_v30  ;;  %v384_v63 = vmul.f32 %v383_v49, %v1522_v37  ;;  %v385_v36 = vmul.f32 %v383_v49, %v1529_v39  ;;  %v504_v43 = vmul.f32 %v1545_v46, %v1738_v20 }
  0x47   : > { %v505_v12 = vmul.f32 %v1548_v47, %v1741_v23  ;;  %1245 = vmatprep.mubr.msk.bf16.mxu1 %vm1337_vm0, %v2280_v35  ;;  %v374_v13 = vadd.f32 %v372_v15, %v368_v1  ;;  %v375_v21 = vadd.f32 %v373_v25, %v369_v28  ;;  %v507_v50 = vmul.f32 %v1551_v48, %v1779_v42 }
  0x48   : > { %v509_v11 = vmul.f32 %v1563_v52, %v1782_v0  ;;  %v511_v16 = vmul.f32 %v1578_v57, %v365_v33  ;;  %v513_v29 = vmul.f32 %v1581_v58, %v371_v8  ;;  %v1852_v6 = vmul.f32 %v1599_v9, %v377_v26 }
  0x49   : > { %v1855_v4 = vmul.f32 %v1602_v10, %v383_v49  ;;  %v380_v15 = vadd.f32 %v378_v14, %v374_v13  ;;  %v381_v25 = vadd.f32 %v379_v51, %v375_v21  ;;  %v573_v30 = vmul.f32 %v1570_v54, %v1738_v20 }
  0x4a   : > { %v574_v1 = vmul.f32 %v1573_v55, %v1741_v23  ;;  %v576_v28 = vmul.f32 %v1596_v62, %v1779_v42  ;;  %v578_v39 = vmul.f32 %v1667_v44, %v1782_v0  ;;  %v1868_v37 = vstv %s1814_s18 }
  0x4b   : > { %v1871_v32 = vstv %s1816_s21  ;;  %v386_v14 = vadd.f32 %v384_v63, %v380_v15  ;;  %v387_v51 = vadd.f32 %v385_v36, %v381_v25  ;;  %v580_v20 = vmul.f32 %v1670_v45, %v365_v33 }
  0x4c   : > { %v1877_v13 = vstv %s1820_s12  ;;  %v1880_v23 = vmul.f32 %v1772_v3, %v371_v8  ;;  %v1883_v42 = vmul.f32 %v1787_v24, %v377_v26  ;;  %v1886_v0 = vstv %s1828_s22 }
  0x4d   : > { %v491_v21 = vadd.f32 %v1585_v59, %v1567_v53  ;;  %v650_v31 = vpack.c.bf16 %v387_v51, %v386_v14  ;;  %v506_v63 = vadd.f32 %v505_v12, %v504_v43  ;;  %v519_v36 = vmul.f32 %v1545_v46, %v1868_v37 }
  0x4e   : > { %v520_v33 = vmul.f32 %v1548_v47, %v1871_v32  ;;  %v1895_v8 = vmul.f32 %v1805_v19, %v383_v49  ;;  %v1898_v15 = vstv %s1839_s23  ;;  %v522_v25 = vmul.f32 %v1551_v48, %v1877_v13 }
  0x4f   : > { %v493_v26 = vadd.f32 %v1589_v60, %v491_v21  ;;  %1234 = vmatmul.mubr.msk.bf16.gmra.mrb[4].mxu0 %vm662_vm1, %v650_v31  ;;  %v1905_v53 = vstv %s1847_s24  ;;  %v508_v59 = vadd.f32 %v507_v50, %v506_v63  ;;  %v524_v12 = vmul.f32 %v1563_v52, %v1886_v0 }
  0x50   : > { %v521_v43 = vadd.f32 %v520_v33, %v519_v36  ;;  %v1910_v14 = vstv %s1857_s25  ;;  %v534_v60 = vmul.f32 %v1545_v46, %v1642_v34  ;;  %v535_v51 = vmul.f32 %v1548_v47, %v1659_v38  ;;  %1237 = vmatprep.mubr.msk.bf16.mxu0 %vm1337_vm0, %v2280_v35  ;;  %v2283_v33 = vld [vmem:[#allocation21_spill] sm:$0xff] }
  0x51   : > { %v495_v49 = vadd.f32 %v1593_v61, %v493_v26  ;;  %v510_v31 = vadd.f32 %v509_v11, %v508_v59  ;;  %v526_v50 = vmul.f32 %v1578_v57, %v1898_v15  ;;  %v537_v63 = vmul.f32 %v1551_v48, %v1662_v40 }
  0x52   : > { %v523_v21 = vadd.f32 %v522_v25, %v521_v43  ;;  %v1924_v36 = vstv %s1873_s26  ;;  %v528_v61 = vmul.f32 %v1581_v58, %v1905_v53  ;;  %v536_v46 = vadd.f32 %v535_v51, %v534_v60  ;;  %v2284_v43 = vld [vmem:[#allocation32_spill] sm:$0xff] }
  0x53   : > { %v539_v47 = vmul.f32 %v1563_v52, %v1684_v56  ;;  %v497_v26 = vadd.f32 %v2283_v33, %v495_v49  ;;  %v512_v35 = vadd.f32 %v511_v16, %v510_v31  ;;  %v530_v25 = vmul.f32 %v1599_v9, %v1910_v14  ;;  %v2287_v49 = vld [vmem:[#allocation35_spill] sm:$0xff]  ;;  %v2288_v31 = vld [vmem:[#allocation28_spill] sm:$0xff] }
  0x54   : > { %v525_v11 = vadd.f32 %v524_v12, %v523_v21  ;;  %v538_v59 = vadd.f32 %v537_v63, %v536_v46  ;;  %v541_v48 = vmul.f32 %v1578_v57, %v2284_v43  ;;  %v560_v18 = vadd.f32 %v2286_v22, %v2285_v27  ;;  %v2289_v57 = vld [vmem:[#allocation22_spill] sm:$0xff] }
  0x55   : > { %v575_v17 = vadd.f32 %v574_v1, %v573_v30  ;;  %v514_v7 = vadd.f32 %v513_v29, %v512_v35  ;;  %v588_v52 = vmul.f32 %v1570_v54, %v1868_v37  ;;  %v589_v16 = vmul.f32 %v1573_v55, %v1871_v32 }
  0x56   : > { %v527_v60 = vadd.f32 %v526_v50, %v525_v11  ;;  %v540_v12 = vadd.f32 %v539_v47, %v538_v59  ;;  %v543_v51 = vmul.f32 %v1581_v58, %v2287_v49  ;;  %v562_v21 = vadd.f32 %v2288_v31, %v560_v18  ;;  %v2290_v50 = vld [vmem:[#allocation33_spill] sm:$0xff]  ;;  %v2291_v58 = vld [vmem:[#allocation38_spill] sm:$0xff]  ;;  %v2293_v59 = vld [vmem:[#allocation24_spill] sm:$0xff] }
  0x57   : > { %v577_v63 = vadd.f32 %v576_v28, %v575_v17  ;;  %v499_v46 = vadd.f32 %v2289_v57, %v497_v26  ;;  %v516_v22 = vadd.f32 %v1852_v6, %v514_v7  ;;  %v590_v27 = vadd.f32 %v589_v16, %v588_v52  ;;  %v2292_v6 = vld [vmem:[#allocation34_spill] sm:$0xff] }
  0x58   : > { %v591_v29 = vmul.f32 %v1596_v62, %v1877_v13  ;;  %v529_v30 = vadd.f32 %v528_v61, %v527_v60  ;;  %v542_v1 = vadd.f32 %v541_v48, %v540_v12  ;;  %v564_v33 = vadd.f32 %v2290_v50, %v562_v21 }
  0x59   : > { %v579_v35 = vadd.f32 %v578_v39, %v577_v63  ;;  %v532_v47 = vmul.f32 %v1602_v10, %v1924_v36  ;;  %v545_v18 = vmul.f32 %v1599_v9, %v2291_v58  ;;  %v593_v28 = vmul.f32 %v1667_v44, %v1886_v0 }
  0x5a   : > { %v592_v17 = vadd.f32 %v591_v29, %v590_v27  ;;  %v544_v7 = vadd.f32 %v543_v51, %v542_v1  ;;  %v566_v26 = vadd.f32 %v2292_v6, %v564_v33  ;;  %v595_v61 = vmul.f32 %v1670_v45, %v1898_v15 }
  0x5b   : > { %v581_v11 = vadd.f32 %v580_v20, %v579_v35  ;;  %v501_v39 = vadd.f32 %v2293_v59, %v499_v46  ;;  %v518_v48 = vadd.f32 %v1855_v4, %v516_v22  ;;  %v597_v9 = vmul.f32 %v1772_v3, %v1905_v53  ;;  %v2301_v59 = vld [vmem:[#allocation10_spill] sm:$0xff] }
  0x5c   : > { %v594_v60 = vadd.f32 %v593_v28, %v592_v17  ;;  %v531_v52 = vadd.f32 %v530_v25, %v529_v30  ;;  %v568_v16 = vadd.f32 %v1801_v41, %v566_v26  ;;  %v599_v20 = vmul.f32 %v1787_v24, %v1910_v14  ;;  %v2294_v25 = vld [vmem:[#allocation39_spill] sm:$0xff]  ;;  %v2300_v26 = vld [vmem:[#allocation9_spill] sm:$0xff] }
  0x5d   : > { %v583_v12 = vadd.f32 %v1880_v23, %v581_v11  ;;  %v603_v31 = vmul.f32 %v1570_v54, %v1642_v34  ;;  %v604_v4 = vmul.f32 %v1573_v55, %v1659_v38  ;;  %v606_v21 = vmul.f32 %v1596_v62, %v1662_v40  ;;  %v2295_v34 = vld [vmem:[#allocation25_spill] sm:$0xff] }
  0x5e   : > { %v596_v51 = vadd.f32 %v595_v61, %v594_v60  ;;  %v546_v63 = vadd.f32 %v545_v18, %v544_v7  ;;  %v547_v41 = vmul.f32 %v1602_v10, %v2294_v25  ;;  %v570_v23 = vadd.f32 %v1811_v2, %v568_v16 }
  0x5f   : > { %v585_v57 = vadd.f32 %v1883_v42, %v583_v12  ;;  %v601_v22 = vmul.f32 %v1805_v19, %v1924_v36  ;;  %v605_v54 = vadd.f32 %v604_v4, %v603_v31  ;;  %v608_v55 = vmul.f32 %v1667_v44, %v1684_v56  ;;  %v2296_v44 = vld [vmem:[#allocation5_spill] sm:$0xff] }
  0x60   : > { %v598_v46 = vadd.f32 %v597_v9, %v596_v51  ;;  %v503_v38 = vadd.f32 %v2295_v34, %v501_v39  ;;  %v533_v62 = vadd.f32 %v532_v47, %v531_v52  ;;  %v572_v40 = vadd.f32 %v1824_v5, %v570_v23  ;;  %v2297_v47 = vld [vmem:[#allocation6_spill] sm:$0xff]  ;;  %v2304_v12 = vld [vmem:[#allocation13_spill] sm:$0xff] }
  0x61   : > { %v587_v10 = vadd.f32 %v1895_v8, %v585_v57  ;;  %v607_v27 = vadd.f32 %v606_v21, %v605_v54  ;;  %v610_v42 = vmul.f32 %v1670_v45, %v2284_v43  ;;  %v622_v29 = vrot.slane %v518_v48, 7  ;;  %v2298_v43 = vld [vmem:[#allocation7_spill] sm:$0xff]  ;;  %v2305_v51 = vld [vmem:[#allocation14_spill] sm:$0xff]  ;;  %v2307_v57 = vld [vmem:[#allocation16_spill] sm:$0xff] }
  0x62   : > { %v600_v2 = vadd.f32 %v599_v20, %v598_v46  ;;  %v548_v30 = vadd.f32 %v547_v41, %v546_v63  ;;  %v612_v1 = vmul.f32 %v1772_v3, %v2287_v49  ;;  %v636_v50 = vrot.slane %v572_v40, 4  ;;  %v2299_v3 = vld [vmem:[#allocation8_spill] sm:$0xff]  ;;  %v2306_v41 = vld [vmem:[#allocation15_spill] sm:$0xff] }
  0x63   : > { %v390_v56 = vmul.f32 %v1868_v37, %v2296_v44  ;;  %v609_v35 = vadd.f32 %v608_v55, %v607_v27  ;;  %v637_v5 = vrot.slane %v587_v10, 3  ;;  %v391_v8 = vmul.f32 %v1868_v37, %v2297_v47 }
  0x64   : > { %v602_v33 = vadd.f32 %v601_v22, %v600_v2  ;;  %v614_v18 = vmul.f32 %v1787_v24, %v2291_v58  ;;  %v616_v45 = vmul.f32 %v1805_v19, %v2294_v25  ;;  %v394_v17 = vmul.f32 %v1871_v32, %v2298_v43  ;;  %v2302_v58 = vld [vmem:[#allocation11_spill] sm:$0xff] }
  0x65   : > { %v395_v49 = vmul.f32 %v1871_v32, %v2299_v3  ;;  %v611_v28 = vadd.f32 %v610_v42, %v609_v35  ;;  %v624_v7 = vsel %vm623_vm2, %v622_v29, %v503_v38  ;;  %v625_v6 = vrot.slane %v533_v62, 6  ;;  %v2303_v32 = vld [vmem:[#allocation12_spill] sm:$0xff]  ;;  %v2309_v38 = vld [vmem:[#allocation18_spill] sm:$0xff]  ;;  %v2310_v42 = vld [vmem:[#allocation19_spill] sm:$0xff] }
  0x66   : > { %v400_v11 = vmul.f32 %v1877_v13, %v2300_v26  ;;  %v396_v37 = vadd.f32 %v394_v17, %v390_v56  ;;  %v401_v24 = vmul.f32 %v1877_v13, %v2301_v59  ;;  %v406_v19 = vmul.f32 %v1886_v0, %v2302_v58  ;;  %v2311_v29 = vld [vmem:[#allocation20_spill] sm:$0xff] }
  0x67   : > { %v397_v61 = vadd.f32 %v395_v49, %v391_v8  ;;  %v613_v39 = vadd.f32 %v612_v1, %v611_v28  ;;  %v639_v48 = vsel %vm638_vm3, %v637_v5, %v636_v50  ;;  %v640_v60 = vrot.slane %v602_v33, 2 }
  0x68   : > { %v407_v9 = vmul.f32 %v1886_v0, %v2303_v32  ;;  %v402_v52 = vadd.f32 %v400_v11, %v396_v37  ;;  %v412_v20 = vmul.f32 %v1898_v15, %v2304_v12  ;;  %v413_v31 = vmul.f32 %v1898_v15, %v2305_v51  ;;  %v2308_v15 = vld [vmem:[#allocation17_spill] sm:$0xff] }
  0x69   : > { %v403_v16 = vadd.f32 %v401_v24, %v397_v61  ;;  %v615_v4 = vadd.f32 %v614_v18, %v613_v39  ;;  %v627_v13 = vsel %vm626_vm4, %v625_v6, %v624_v7  ;;  %v628_v21 = vrot.slane %v548_v30, 5 }
  0x6a   : > { %v408_v63 = vadd.f32 %v406_v19, %v402_v52  ;;  %v418_v23 = vmul.f32 %v1905_v53, %v2306_v41  ;;  %v419_v0 = vmul.f32 %v1905_v53, %v2307_v57  ;;  %v642_v22 = vsel %vm641_vm5, %v640_v60, %v639_v48  ;;  %v2312_v19 = vld [vmem:[#allocation29_spill] sm:$0xff] }
  0x6b   : > { %v409_v25 = vadd.f32 %v407_v9, %v403_v16  ;;  %v617_v46 = vadd.f32 %v616_v45, %v615_v4  ;;  %v424_v34 = vmul.f32 %v1910_v14, %v2308_v15  ;;  %v425_v62 = vmul.f32 %v1910_v14, %v2309_v38 }
  0x6c   : > { %v414_v54 = vadd.f32 %v412_v20, %v408_v63  ;;  %v630_v40 = vsel %vm629_vm6, %v628_v21, %v627_v13  ;;  %v430_v53 = vmul.f32 %v1924_v36, %v2310_v42  ;;  %v431_v30 = vmul.f32 %v1924_v36, %v2311_v29 }
  0x6d   : > { %v415_v55 = vadd.f32 %v413_v31, %v409_v25  ;;  %v643_v10 = vrot.slane %v617_v46, 1  ;;  %v754_v47 = vlaneseq }
  0x6e   : > { %v420_v2 = vadd.f32 %v418_v23, %v414_v54 }
  0x6f   : > { %v421_v27 = vadd.f32 %v419_v0, %v415_v55  ;;  %v645_v1 = vsel %vm644_vm7, %v643_v10, %v642_v22  ;;  %v2029_v8 = vshrl.u32 %v754_v47, 7  ;;  %v2313_v22 = vld [vmem:[#allocation41_spill] sm:$0xff]  ;;  %v1340_v47 = vmov 1966171168  }
  0x70   : > { %v648_v50 = vsel %vm647_vm8, %v630_v40, %v645_v1  ;;  %v426_v44 = vadd.f32 %v424_v34, %v420_v2 }
  0x71   : > { %v427_v56 = vadd.f32 %v425_v62, %v421_v27  ;;  %v653_v33 = vpack.c.bf16 %v648_v50, %v648_v50  ;;  %vm810_vm9 = vcmp.lt.s32.totalorder %v2029_v8, 1  ;;  %vm827_vm10 = vcmp.lt.s32.totalorder %v2029_v8, 7 }
  0x72   : > { %v432_v35 = vadd.f32 %v430_v53, %v426_v44  ;;  %vm837_vm12 = vcmp.eq.s32.totalorder %v2029_v8, 0 }
  0x73   : > { %v433_v5 = vadd.f32 %v431_v30, %v427_v56  ;;  %1246 = vmatmul.mubr.msk.bf16.gmra.mrb[4].mxu1 %vm662_vm1, %v653_v33 }
  0x75   : > { %v651_v14 = vpack.c.bf16 %v433_v5, %v432_v35  ;;  %v2314_v35 = vld [vmem:[#allocation31_spill] sm:$0xff] }
  0x77   : > { %1238 = vmatmul.mubr.msk.bf16.gmra.mrb[8].mxu0 %vm662_vm1, %v651_v14 }
  0xa3   : > { %v971_v58 = vpop.permute.xlu0 %970 }
  0xa4   : > { %v975_v33 = vpop.permute.xlu1 %974 }
 0x10c   : > { %v712_v18 = vpop.f32.mrb[0].mxu0 }
 0x10d   : > { %v800_v45 = vrot.slane %v712_v18, 7  ;;  %v819_v43 = vrot.slane %v712_v18, 1  ;;  %v1231_v36 = vpop.f32.mrb[1].mxu0  ;;  %v2037_v26 = vmul.f32 0.75, %v712_v18  ;;  %v752_v18 = vunpack.c.l.s4 %v1340_v47 }
 0x10e   : > { %v715_v17 = vpop.f32.mrb[2].mxu0 }
 0x10f   : > { %v801_v3 = vrot.slane %v715_v17, 7  ;;  %v820_v49 = vrot.slane %v715_v17, 1  ;;  %v1232_v28 = vpop.f32.mrb[3].mxu0  ;;  %v2039_v11 = vmul.f32 0.75, %v715_v17  ;;  %v2110_v17 = vadd.s32 8, %v2029_v8 }
 0x111   : > { %v817_v7 = vsel %vm810_vm9, %v800_v45, %v801_v3  ;;  %v834_v6 = vsel %vm827_vm10, %v819_v43, %v820_v49  ;;  %vm868_vm13 = vcmp.eq.s32.totalorder %v2110_v17, 15  ;;  %v2319_v17 = vld [vmem:[#allocation30_spill] sm:$0xff] }
 0x112   : > { %v906_v37 = vmul.f32 0.25, %v817_v7  ;;  %v921_v61 = vmul.f32 0.25, %v834_v6  ;;  %v841_v7 = vsub.s32 0, %v2029_v8 }
 0x114   : > { %v914_v59 = vadd.f32 %v906_v37, %v2039_v11  ;;  %v929_v24 = vadd.f32 %v921_v61, %v2037_v26 }
 0x116   : > { %v946_v39 = vadd.f32 %v2312_v19, %v914_v59  ;;  %v994_v48 = vadd.f32 %v971_v58, %v929_v24 }
 0x118   : > { %1010 = vrot.lane.b32.xlu0 %v994_v48, %s1339_s30  ;;  %955 = vst.msk [vmem:[%s2048_s29 + $0x8] sm:$0xff] %vm953_vm11, %v946_v39 }
 0x119   : > { %v2054_v60 = vpop.f32.mrb[0].mxu1 }
 0x11a   : > { %v1243_v32 = vpop.f32.mrb[1].mxu1  ;;  %v806_v52 = vrot.slane %v2054_v60, 7  ;;  %v825_v16 = vrot.slane %v2054_v60, 1  ;;  %v2075_v63 = vmul.f32 0.75, %v2054_v60 }
 0x11b   : > { %v739_v9 = vpop.f32.mrb[2].mxu1 }
 0x11c   : > { %v807_v12 = vrot.slane %v739_v9, 7  ;;  %v826_v20 = vrot.slane %v739_v9, 1  ;;  %v1244_v51 = vpop.f32.mrb[3].mxu1  ;;  %v2077_v25 = vmul.f32 0.75, %v739_v9 }
 0x11e   : > { %v811_v31 = vsel %vm810_vm9, %v806_v52, %v807_v12  ;;  %v2064_v4 = vsel %vm810_vm9, %v807_v12, %v800_v45  ;;  %v828_v13 = vsel %vm827_vm10, %v825_v16, %v826_v20  ;;  %v2072_v21 = vsel %vm827_vm10, %v826_v20, %v819_v43 }
 0x11f   : > { %v912_v41 = vmul.f32 0.25, %v811_v31  ;;  %v927_v23 = vmul.f32 0.25, %v828_v13  ;;  %v753_v45 = vunpack.c.0.s8 %v752_v18 }
 0x121   : > { %v920_v57 = vadd.f32 %v912_v41, %v2077_v25  ;;  %v2081_v0 = vadd.f32 %v927_v23, %v2075_v63  ;;  %v756_v43 = vsub.s32 %v753_v45, %v2029_v8  ;;  %v977_v8 = vpop.permute.xlu1 %976 }
 0x122   : > { %v720_v46 = vpop.f32.mrb[4].mxu0 }
 0x123   : > { %v952_v54 = vadd.f32 %v2313_v22, %v920_v57  ;;  %v802_v55 = vrot.slane %v720_v46, 7  ;;  %v821_v15 = vrot.slane %v720_v46, 1  ;;  %v1235_v34 = vpop.f32.mrb[5].mxu0  ;;  %v2098_v29 = vmul.f32 0.75, %v720_v46 }
 0x124   : > { %v723_v38 = vpop.f32.mrb[6].mxu0 }
 0x125   : > { %v2086_v62 = vsel %vm810_vm9, %v801_v3, %v802_v55  ;;  %v2090_v40 = vsel %vm827_vm10, %v820_v49, %v821_v15  ;;  %v803_v10 = vrot.slane %v723_v38, 7  ;;  %v822_v2 = vrot.slane %v723_v38, 1  ;;  %v1236_v27 = vpop.f32.mrb[7].mxu0  ;;  %961 = vst.msk [vmem:[%s2048_s29 + $0x38] sm:$0xff] %vm953_vm11, %v952_v54 }
 0x126   : > { %v2100_v30 = vmul.f32 0.75, %v723_v38 }
 0x127   : > { %v815_v42 = vsel %vm810_vm9, %v802_v55, %v803_v10  ;;  %v832_v53 = vsel %vm827_vm10, %v821_v15, %v822_v2 }
 0x128   : > { %v908_v1 = vmul.f32 0.25, %v815_v42  ;;  %v923_v50 = vmul.f32 0.25, %v832_v53  ;;  %v973_v42 = vpop.permute.xlu0 %972 }
 0x12a   : > { %v916_v44 = vadd.f32 %v908_v1, %v2100_v30  ;;  %v931_v56 = vadd.f32 %v923_v50, %v2098_v29 }
 0x12c   : > { %v948_v5 = vadd.f32 %v2314_v35, %v916_v44  ;;  %v996_v14 = vadd.f32 %v975_v33, %v931_v56 }
 0x12e   : > { %1014 = vrot.lane.b32.xlu0 %v996_v14, %s1339_s30  ;;  %957 = vst.msk [vmem:[%s2048_s29 + $0x18] sm:$0xff] %vm953_vm11, %v948_v5 }
 0x146   : > { %v744_v36 = vpop.f32.mrb[4].mxu1 }
 0x147   : > { %v757_v3 = vrot.slane %v744_v36, %v756_v43  ;;  %v775_v49 = vcombine.high %v744_v36, %v744_v36  ;;  %v1247_v28 = vpop.f32.mrb[5].mxu1 }
 0x148   : > { %v747_v6 = vpop.f32.mrb[6].mxu1 }
 0x149   : > { %v758_v37 = vcombine.high %v757_v3, %v757_v3  ;;  %v765_v61 = vrot.slane %v757_v3, %v756_v43  ;;  %v782_v59 = vrot.slane %v775_v49, %v756_v43  ;;  %v1248_v24 = vpop.f32.mrb[7].mxu1 }
 0x14a   : > { %v728_v58 = vpop.f32.mrb[8].mxu0 }
 0x14b   : > { %v804_v19 = vrot.slane %v728_v58, 7  ;;  %v823_v39 = vrot.slane %v728_v58, 1  ;;  %v901_v48 = vmul.f32 0.75, %v728_v58  ;;  %v1239_v32 = vpop.f32.mrb[9].mxu0  ;;  %v772_v9 = vrot.slane %v758_v37, %v756_v43 }
 0x14c   : > { %v773_v12 = vcombine.high %v765_v61, %v765_v61  ;;  %v783_v20 = vcombine.high %v782_v59, %v782_v59  ;;  %v790_v51 = vrot.slane %v782_v59, %v756_v43  ;;  %v731_v31 = vpop.f32.mrb[10].mxu0  ;;  %v842_v13 = vrot.slane %v765_v61, %v841_v7  ;;  %v979_v61 = vpop.permute.xlu0 %978  ;;  %v2315_v59 = vld [vmem:[#allocation36_spill] sm:$0xff] }
 0x14d   : > { %v814_v41 = vsel %vm810_vm9, %v803_v10, %v804_v19  ;;  %v831_v23 = vsel %vm827_vm10, %v822_v2, %v823_v39  ;;  %v805_v57 = vrot.slane %v731_v31, 7  ;;  %v1240_v46 = vpop.f32.mrb[11].mxu0  ;;  %v774_v22 = vcombine.high %v772_v9, %v772_v9 }
 0x14e   : > { %v797_v54 = vrot.slane %v783_v20, %v756_v43  ;;  %v798_v55 = vcombine.high %v790_v51, %v790_v51  ;;  %v846_v15 = vrot.slane %v772_v9, %v841_v7  ;;  %v850_v34 = vrot.slane %v773_v12, %v841_v7  ;;  %v2317_v9 = vld [vmem:[#allocation23_spill] sm:$0xff] }
 0x14f   : > { %v859_v38 = vsel %vm837_vm12, %v842_v13, %v2064_v4  ;;  %v872_v27 = vrot.slane %v790_v51, %v841_v7  ;;  %v812_v10 = vsel %vm810_vm9, %v805_v57, %v806_v52  ;;  %v854_v2 = vrot.slane %v774_v22, %v841_v7  ;;  %v2318_v13 = vld [vmem:[#allocation40_spill] sm:$0xff] }
 0x150   : > { %v799_v53 = vcombine.high %v797_v54, %v797_v54  ;;  %v861_v1 = vsel %vm837_vm12, %v846_v15, %v2086_v62  ;;  %v905_v50 = vmul.f32 0.25, %v859_v38  ;;  %v863_v56 = vsel %vm837_vm12, %v850_v34, %v814_v41  ;;  %v983_v22 = vpop.permute.xlu0 %982 }
 0x151   : > { %v907_v44 = vmul.f32 0.25, %v861_v1  ;;  %v876_v33 = vrot.slane %v797_v54, %v841_v7  ;;  %v813_v4 = vsel %vm810_vm9, %v804_v19, %v805_v57  ;;  %v909_v5 = vmul.f32 0.25, %v863_v56  ;;  %v981_v54 = vpop.permute.xlu1 %980 }
 0x152   : > { %v913_v35 = vadd.f32 %v905_v50, %v2037_v26  ;;  %v824_v52 = vrot.slane %v731_v31, 1  ;;  %v865_v14 = vsel %vm837_vm12, %v854_v2, %v812_v10  ;;  %v902_v62 = vmul.f32 0.75, %v731_v31 }
 0x153   : > { %v892_v47 = vsel %vm868_vm13, %v876_v33, %v831_v23  ;;  %v910_v18 = vmul.f32 0.25, %v813_v4  ;;  %v911_v45 = vmul.f32 0.25, %v865_v14  ;;  %v917_v43 = vadd.f32 %v909_v5, %v901_v48 }
 0x154   : > { %v924_v36 = vmul.f32 0.25, %v892_v47  ;;  %v830_v3 = vsel %vm827_vm10, %v823_v39, %v824_v52  ;;  %v829_v26 = vsel %vm827_vm10, %v824_v52, %v825_v16  ;;  %v880_v6 = vrot.slane %v798_v55, %v841_v7  ;;  %v2316_v16 = vld [vmem:[#allocation37_spill] sm:$0xff] }
 0x155   : > { %v918_v49 = vadd.f32 %v910_v18, %v902_v62  ;;  %v919_v28 = vadd.f32 %v911_v45, %v2075_v63  ;;  %v890_v37 = vsel %vm868_vm13, %v872_v27, %v2090_v40  ;;  %v949_v24 = vadd.f32 %v2315_v59, %v917_v43  ;;  %v985_v55 = vpop.permute.xlu1 %984 }
 0x156   : > { %v932_v58 = vadd.f32 %v924_v36, %v2100_v30  ;;  %v922_v60 = vmul.f32 0.25, %v890_v37  ;;  %v884_v19 = vrot.slane %v799_v53, %v841_v7  ;;  %v894_v63 = vsel %vm868_vm13, %v880_v6, %v829_v26 }
 0x157   : > { %v950_v39 = vadd.f32 %v2316_v16, %v918_v49  ;;  %v925_v32 = vmul.f32 0.25, %v830_v3  ;;  %v945_v12 = vadd.f32 %v2317_v9, %v913_v35  ;;  %v926_v40 = vmul.f32 0.25, %v894_v63  ;;  %958 = vst.msk [vmem:[%s2048_s29 + $0x20] sm:$0xff] %vm953_vm11, %v949_v24 }
 0x158   : > { %v930_v20 = vadd.f32 %v922_v60, %v2039_v11  ;;  %v896_v51 = vsel %vm868_vm13, %v884_v19, %v2072_v21  ;;  %v915_v31 = vadd.f32 %v907_v44, %v2098_v29  ;;  %v951_v41 = vadd.f32 %v2318_v13, %v919_v28 }
 0x159   : > { %v928_v30 = vmul.f32 0.25, %v896_v51  ;;  %v933_v7 = vadd.f32 %v925_v32, %v901_v48  ;;  %954 = vst.msk [vmem:[%s2048_s29] sm:$0xff] %vm953_vm11, %v945_v12  ;;  %959 = vst.msk [vmem:[%s2048_s29 + $0x28] sm:$0xff] %vm953_vm11, %v950_v39  ;;  %v934_v23 = vadd.f32 %v926_v40, %v902_v62  ;;  %v997_v48 = vadd.f32 %v977_v8, %v932_v58 }
 0x15a   : > { %v995_v57 = vadd.f32 %v973_v42, %v930_v20  ;;  %v947_v21 = vadd.f32 %v2319_v17, %v915_v31  ;;  %960 = vst.msk [vmem:[%s2048_s29 + $0x30] sm:$0xff] %vm953_vm11, %v951_v41  ;;  %v1000_v29 = vadd.f32 %v983_v22, %v2081_v0 }
 0x15b   : > { %v936_v11 = vadd.f32 %v928_v30, %v2077_v25  ;;  %v998_v46 = vadd.f32 %v979_v61, %v933_v7  ;;  %v999_v25 = vadd.f32 %v981_v54, %v934_v23 }
 0x15c   : > { %1012 = vrot.lane.b32.xlu1 %v995_v57, %s1339_s30  ;;  %956 = vst.msk [vmem:[%s2048_s29 + $0x10] sm:$0xff] %vm953_vm11, %v947_v21 }
 0x15d   : > { %1018 = vrot.lane.b32.xlu0 %v998_v46, %s1339_s30  ;;  %v1001_v15 = vadd.f32 %v985_v55, %v936_v11 }
 0x160   : > { %1016 = vrot.lane.b32.xlu1 %v997_v48, %s1339_s30 }
 0x161   : > { %1022 = vrot.lane.b32.xlu0 %v1000_v29, %s1339_s30 }
 0x164   : > { %1020 = vrot.lane.b32.xlu1 %v999_v25, %s1339_s30 }
 0x168   : > { %1024 = vrot.lane.b32.xlu1 %v1001_v15, %s1339_s30 }
 0x18a   : > { %v1011_v34 = vpop.permute.xlu0 %1010 }
 0x18b   : > { %1035 = vst.msk [vmem:[%s2048_s29] sm:$0xff] %vm1034_vm14, %v1011_v34 }
 0x1a0   : > { %v1015_v0 = vpop.permute.xlu0 %1014 }
 0x1a1   : > { %1037 = vst.msk [vmem:[%s2048_s29 + $0x10] sm:$0xff] %vm1034_vm14, %v1015_v0 }
 0x1ce   : > { %v1013_v38 = vpop.permute.xlu1 %1012 }
 0x1cf   : > { %1036 = vst.msk [vmem:[%s2048_s29 + $0x8] sm:$0xff] %vm1034_vm14, %v1013_v38  ;;  %v1019_v27 = vpop.permute.xlu0 %1018 }
 0x1d0   : > { %1039 = vst.msk [vmem:[%s2048_s29 + $0x20] sm:$0xff] %vm1034_vm14, %v1019_v27 }
 0x1d2   : > { %v1017_v10 = vpop.permute.xlu1 %1016 }
 0x1d3   : > { %1038 = vst.msk [vmem:[%s2048_s29 + $0x18] sm:$0xff] %vm1034_vm14, %v1017_v10  ;;  %v1023_v42 = vpop.permute.xlu0 %1022 }
 0x1d4   : > { %1041 = vst.msk [vmem:[%s2048_s29 + $0x30] sm:$0xff] %vm1034_vm14, %v1023_v42 }
 0x1d6   : > { %v1021_v53 = vpop.permute.xlu1 %1020 }
 0x1d7   : > { %1040 = vst.msk [vmem:[%s2048_s29 + $0x28] sm:$0xff] %vm1034_vm14, %v1021_v53 }
 0x1da   : > { %v1025_v2 = vpop.permute.xlu1 %1024 }
 0x1db   : > { %1042 = vst.msk [vmem:[%s2048_s29 + $0x38] sm:$0xff] %vm1034_vm14, %v1025_v2 }
 0x1dc PF: > { %s15_s17 = sadd.s32 1, %s1333_s17   ;;  %s2320_s15 = smov %s1329_s16 }
 0x1dd   : > { %p12_p2 = scmp.ge.s32.totalorder %s15_s17, 4   ;;  %s2321_s16 = smov %s2323_s19 }
 0x1df   :  { %14 = sbr.rel (!%p12_p2) target bundleno = 2 (0x2), region = 77 }
 0x1e6   :  { %1073 = vsyncpa [#allocation3], 1 }
 0x1e7   :  { %1075 = vsyncpa [#allocation3 + $0x1], 1 }

</bundles_post_ra>
